<compile_context>
chip_gen: v6e
topology: v6e:2x2x1
jax: 0.10.0
libtpu: 0.0.40
codegen_flags: <defaults>
</compile_context>

<pallas_src>
import numpy as np

import jax
import jax.numpy as jnp
from jax.experimental import pallas as pl
from jax.experimental.pallas import tpu as pltpu


# ----------------------------------------------------------------------------
# Parameter init (PyTorch-like layouts) and one-time repack for the kernel
# ----------------------------------------------------------------------------
def init_params(key):
    ks = jax.random.split(key, 10)
    s = 0.1
    return {
        "w_conv1": s * jax.random.normal(ks[0], (6, 1, 5, 5), jnp.float32),
        "b_conv1": s * jax.random.normal(ks[1], (6,), jnp.float32),
        "w_conv2": s * jax.random.normal(ks[2], (16, 6, 5, 5), jnp.float32),
        "b_conv2": s * jax.random.normal(ks[3], (16,), jnp.float32),
        "w_fc1": s * jax.random.normal(ks[4], (120, 400), jnp.float32),
        "b_fc1": s * jax.random.normal(ks[5], (120,), jnp.float32),
        "w_fc2": s * jax.random.normal(ks[6], (84, 120), jnp.float32),
        "b_fc2": s * jax.random.normal(ks[7], (84,), jnp.float32),
        "w_fc3": s * jax.random.normal(ks[8], (10, 84), jnp.float32),
        "b_fc3": s * jax.random.normal(ks[9], (10,), jnp.float32),
    }


def prepare_params(p):
    """One-time host-side repack of PyTorch-layout params into the matrices the
    fused kernel consumes: banded conv matrices, block-diagonal pooling
    matrices and a permuted FC1 weight (absorbs the NCHW flatten order)."""
    w1 = np.asarray(p["w_conv1"], np.float32)   # (6, 1, 5, 5)
    b1 = np.asarray(p["b_conv1"], np.float32)   # (6,)
    w2 = np.asarray(p["w_conv2"], np.float32)   # (16, 6, 5, 5)
    b2 = np.asarray(p["b_conv2"], np.float32)   # (16,)
    wf1 = np.asarray(p["w_fc1"], np.float32)    # (120, 400)
    bf1 = np.asarray(p["b_fc1"], np.float32)
    wf2 = np.asarray(p["w_fc2"], np.float32)    # (84, 120)
    bf2 = np.asarray(p["b_fc2"], np.float32)
    wf3 = np.asarray(p["w_fc3"], np.float32)    # (10, 84)
    bf3 = np.asarray(p["b_fc3"], np.float32)

    # conv1 as 5 banded matrices:  c1[oh, oc*28+ow] = sum_i x[oh+i, :] @ V1[i]
    V1 = np.zeros((5, 32, 6 * 28), np.float32)
    for i in range(5):
        for oc in range(6):
            for ow in range(28):
                for j in range(5):
                    V1[i, ow + j, oc * 28 + ow] = w1[oc, 0, i, j]
    b1row = np.repeat(b1, 28).reshape(1, 6 * 28)

    # 2x2 avg-pool #1: rows pooled on the left, per-channel columns on the right
    P1L = np.zeros((14, 28), np.float32)
    P1R = np.zeros((6 * 28, 6 * 14), np.float32)
    for ph in range(14):
        P1L[ph, 2 * ph] = 0.5
        P1L[ph, 2 * ph + 1] = 0.5
    for oc in range(6):
        for pw in range(14):
            P1R[oc * 28 + 2 * pw, oc * 14 + pw] = 0.5
            P1R[oc * 28 + 2 * pw + 1, oc * 14 + pw] = 0.5

    # conv2 as 5 banded matrices over the packed (c*14 + w) axis
    V2 = np.zeros((5, 6 * 14, 16 * 10), np.float32)
    for i in range(5):
        for oc in range(16):
            for ow in range(10):
                for c in range(6):
                    for j in range(5):
                        V2[i, c * 14 + ow + j, oc * 10 + ow] = w2[oc, c, i, j]
    b2row = np.repeat(b2, 10).reshape(1, 16 * 10)

    # 2x2 avg-pool #2
    P2L = np.zeros((5, 10), np.float32)
    P2R = np.zeros((16 * 10, 16 * 5), np.float32)
    for ph in range(5):
        P2L[ph, 2 * ph] = 0.5
        P2L[ph, 2 * ph + 1] = 0.5
    for oc in range(16):
        for pw in range(5):
            P2R[oc * 10 + 2 * pw, oc * 5 + pw] = 0.5
            P2R[oc * 10 + 2 * pw + 1, oc * 5 + pw] = 0.5

    # fc1 weight permuted so the kernel consumes p2[ph, oc*5+pw] directly.
    # PyTorch flatten order is f = oc*25 + ph*5 + pw:
    #   Wre[ph, oc*5+pw, n] = wf1[n, oc*25 + ph*5 + pw]
    Wre = np.transpose(wf1.T.reshape(16, 5, 5, 120), (1, 0, 2, 3)).reshape(5, 80, 120)

    pack = {
        "V1": V1, "b1row": b1row, "P1L": P1L, "P1R": P1R,
        "V2": V2, "b2row": b2row, "P2L": P2L, "P2R": P2R,
        "Wre": Wre, "bf1": bf1.reshape(1, 120),
        "Wf2": wf2.T, "bf2": bf2.reshape(1, 84),
        "Wf3": wf3.T, "bf3": bf3.reshape(1, 10),
    }
    return {k: jnp.asarray(v, jnp.float32) for k, v in pack.items()}


# ----------------------------------------------------------------------------
# Fused Pallas kernel: one grid step = one sample, full network
# ----------------------------------------------------------------------------
def _lenet5_kernel(x_ref, v1_ref, b1_ref, p1l_ref, p1r_ref,
                   v2_ref, b2_ref, p2l_ref, p2r_ref,
                   wre_ref, bf1_ref, wf2_ref, bf2_ref, wf3_ref, bf3_ref,
                   out_ref):
    f32 = jnp.float32
    dot = lambda a, b: jnp.dot(a, b, preferred_element_type=f32)

    x = x_ref[0]                                    # (32, 32)  [h, w]

    # conv1 + bias + tanh  ->  c1[oh, oc*28 + ow]   (lane-dense: 168 lanes)
    acc1 = dot(x[0:28, :], v1_ref[0])
    for i in range(1, 5):
        acc1 = acc1 + dot(x[i:i + 28, :], v1_ref[i])
    c1 = jnp.tanh(acc1 + b1_ref[...])               # (28, 168)

    # fused 2x2 avg-pool  ->  p1[ph, c*14 + pw]
    p1 = dot(dot(p1l_ref[...], c1), p1r_ref[...])   # (14, 84)

    # conv2 + bias + tanh  ->  c2[oh, oc*10 + ow]
    acc2 = dot(p1[0:10, :], v2_ref[0])
    for i in range(1, 5):
        acc2 = acc2 + dot(p1[i:i + 10, :], v2_ref[i])
    c2 = jnp.tanh(acc2 + b2_ref[...])               # (10, 160)

    # fused 2x2 avg-pool  ->  p2[ph, c*5 + pw]
    p2 = dot(dot(p2l_ref[...], c2), p2r_ref[...])   # (5, 80)

    # fc1 (weight pre-permuted per ph -> no flatten/transpose needed)
    y1 = dot(p2[0:1, :], wre_ref[0])
    for ph in range(1, 5):
        y1 = y1 + dot(p2[ph:ph + 1, :], wre_ref[ph])
    y1 = jnp.tanh(y1 + bf1_ref[...])                # (1, 120)

    y2 = jnp.tanh(dot(y1, wf2_ref[...]) + bf2_ref[...])    # (1, 84)
    y3 = dot(y2, wf3_ref[...]) + bf3_ref[...]               # (1, 10)
    out_ref[0] = y3


def lenet5_forward(x, wp):
    """x: [B, 1, 32, 32] (NCHW, like PyTorch).  wp: output of prepare_params."""
    B = x.shape[0]
    assert x.shape[1:] == (1, 32, 32), x.shape
    x3 = x.reshape(B, 32, 32)

    order = ["V1", "b1row", "P1L", "P1R", "V2", "b2row", "P2L", "P2R",
             "Wre", "bf1", "Wf2", "bf2", "Wf3", "bf3"]
    weights = [wp[k] for k in order]

    def full_spec(a):
        nd = a.ndim
        # Whole-array block, constant index map -> DMA'd once, VMEM-resident.
        return pl.BlockSpec(a.shape, lambda b: (0,) * nd)

    out = pl.pallas_call(
        _lenet5_kernel,
        out_shape=jax.ShapeDtypeStruct((B, 1, 10), jnp.float32),
        grid=(B,),
        in_specs=[pl.BlockSpec((1, 32, 32), lambda b: (b, 0, 0))]
                 + [full_spec(w) for w in weights],
        out_specs=pl.BlockSpec((1, 1, 10), lambda b: (b, 0, 0)),
        compiler_params=pltpu.CompilerParams(
            dimension_semantics=("parallel",)),
    )(x3, *weights)
    return out.reshape(B, 10)


# ----------------------------------------------------------------------------
# Pure-JAX reference (for a correctness cross-check)
# ----------------------------------------------------------------------------
def lenet5_reference(x, p):
    def conv(x, w, b):
        y = jax.lax.conv_general_dilated(
            x, w, window_strides=(1, 1), padding="VALID",
            dimension_numbers=("NCHW", "OIHW", "NCHW"))
        return y + b.reshape(1, -1, 1, 1)

    def pool(x):
        return jax.lax.reduce_window(
            x, 0.0, jax.lax.add, (1, 1, 2, 2), (1, 1, 2, 2), "VALID") / 4.0

    x = pool(jnp.tanh(conv(x, p["w_conv1"], p["b_conv1"])))
    x = pool(jnp.tanh(conv(x, p["w_conv2"], p["b_conv2"])))
    x = x.reshape(x.shape[0], -1)
    x = jnp.tanh(x @ p["w_fc1"].T + p["b_fc1"])
    x = jnp.tanh(x @ p["w_fc2"].T + p["b_fc2"])
    return x @ p["w_fc3"].T + p["b_fc3"]


if __name__ == "__main__":
    key = jax.random.PRNGKey(0)
    k_param, k_in = jax.random.split(key)
    params = init_params(k_param)
    weight_pack = prepare_params(params)   # one-time host-side repack

    # LeNet5 requires 32x32 spatial input so the flatten is 16*5*5.
    x = jax.random.normal(k_in, (2, 1, 32, 32), jnp.float32)

    fwd = jax.jit(lenet5_forward)
    out = fwd(x, weight_pack)
    jax.block_until_ready(out)
    assert out.shape == (2, 10), out.shape

    ref = lenet5_reference(x, params)
    err = float(jnp.max(jnp.abs(out - ref)))
    assert err < 2e-2, f"mismatch vs reference: max abs err = {err}"
    print("KERNEL_OK")
</pallas_src>

<mosaic_0001>
module attributes {stable_mosaic.version = 11 : i64} {
  func.func @_lenet5_kernel(%arg0: i32, %arg1: memref<1x32x32xf32, #tpu.memory_space<vmem>>, %arg2: memref<5x32x168xf32, #tpu.memory_space<vmem>>, %arg3: memref<1x168xf32, #tpu.memory_space<vmem>>, %arg4: memref<14x28xf32, #tpu.memory_space<vmem>>, %arg5: memref<168x84xf32, #tpu.memory_space<vmem>>, %arg6: memref<5x84x160xf32, #tpu.memory_space<vmem>>, %arg7: memref<1x160xf32, #tpu.memory_space<vmem>>, %arg8: memref<5x10xf32, #tpu.memory_space<vmem>>, %arg9: memref<160x80xf32, #tpu.memory_space<vmem>>, %arg10: memref<5x80x120xf32, #tpu.memory_space<vmem>>, %arg11: memref<1x120xf32, #tpu.memory_space<vmem>>, %arg12: memref<120x84xf32, #tpu.memory_space<vmem>>, %arg13: memref<1x84xf32, #tpu.memory_space<vmem>>, %arg14: memref<84x10xf32, #tpu.memory_space<vmem>>, %arg15: memref<1x10xf32, #tpu.memory_space<vmem>>, %arg16: memref<1x1x10xf32, #tpu.memory_space<vmem>>) attributes {dimension_semantics = [#tpu.dimension_semantics<parallel>], iteration_bounds = array<i64: 2>, scalar_prefetch = 0 : i64, scratch_operands = 0 : i64, tpu.core_type = #tpu.core_type<tc>, window_params = [{transform_indices = @transform_0, window_bounds = array<i64: 1, 32, 32>}, {pipeline_mode = #tpu.pipeline_mode<synchronous>, transform_indices = @transform_1, window_bounds = array<i64: 5, 32, 168>}, {pipeline_mode = #tpu.pipeline_mode<synchronous>, transform_indices = @transform_2, window_bounds = array<i64: 1, 168>}, {pipeline_mode = #tpu.pipeline_mode<synchronous>, transform_indices = @transform_3, window_bounds = array<i64: 14, 28>}, {pipeline_mode = #tpu.pipeline_mode<synchronous>, transform_indices = @transform_4, window_bounds = array<i64: 168, 84>}, {pipeline_mode = #tpu.pipeline_mode<synchronous>, transform_indices = @transform_5, window_bounds = array<i64: 5, 84, 160>}, {pipeline_mode = #tpu.pipeline_mode<synchronous>, transform_indices = @transform_6, window_bounds = array<i64: 1, 160>}, {pipeline_mode = #tpu.pipeline_mode<synchronous>, transform_indices = @transform_7, window_bounds = array<i64: 5, 10>}, {pipeline_mode = #tpu.pipeline_mode<synchronous>, transform_indices = @transform_8, window_bounds = array<i64: 160, 80>}, {pipeline_mode = #tpu.pipeline_mode<synchronous>, transform_indices = @transform_9, window_bounds = array<i64: 5, 80, 120>}, {pipeline_mode = #tpu.pipeline_mode<synchronous>, transform_indices = @transform_10, window_bounds = array<i64: 1, 120>}, {pipeline_mode = #tpu.pipeline_mode<synchronous>, transform_indices = @transform_11, window_bounds = array<i64: 120, 84>}, {pipeline_mode = #tpu.pipeline_mode<synchronous>, transform_indices = @transform_12, window_bounds = array<i64: 1, 84>}, {pipeline_mode = #tpu.pipeline_mode<synchronous>, transform_indices = @transform_13, window_bounds = array<i64: 84, 10>}, {pipeline_mode = #tpu.pipeline_mode<synchronous>, transform_indices = @transform_14, window_bounds = array<i64: 1, 10>}, {transform_indices = @transform_15, window_bounds = array<i64: 1, 1, 10>}]} {
    %c0 = arith.constant 0 : index
    %c0_0 = arith.constant 0 : index
    %c0_1 = arith.constant 0 : index
    %0 = vector.load %arg1[%c0, %c0_0, %c0_1] : memref<1x32x32xf32, #tpu.memory_space<vmem>>, vector<1x32x32xf32>
    %1 = vector.shape_cast %0 : vector<1x32x32xf32> to vector<32x32xf32>
    %2 = vector.extract_strided_slice %1 {offsets = [0, 0], sizes = [28, 32], strides = [1, 1]} : vector<32x32xf32> to vector<28x32xf32>
    %c0_2 = arith.constant 0 : index
    %c0_3 = arith.constant 0 : index
    %c0_4 = arith.constant 0 : index
    %3 = vector.load %arg2[%c0_2, %c0_3, %c0_4] : memref<5x32x168xf32, #tpu.memory_space<vmem>>, vector<1x32x168xf32>
    %4 = vector.shape_cast %3 : vector<1x32x168xf32> to vector<32x168xf32>
    %cst = arith.constant dense<0.000000e+00> : vector<28x168xf32>
    %5 = tpu.matmul %2, %4, %cst {dimension_numbers = #tpu.dot_dimension_numbers<[1], [0], [0], [1], [0, 0, 1, 1], [], []>} : vector<28x32xf32>, vector<32x168xf32>, vector<28x168xf32> -> vector<28x168xf32>
    %6 = vector.extract_strided_slice %1 {offsets = [1, 0], sizes = [28, 32], strides = [1, 1]} : vector<32x32xf32> to vector<28x32xf32>
    %c1 = arith.constant 1 : index
    %c0_5 = arith.constant 0 : index
    %c0_6 = arith.constant 0 : index
    %7 = vector.load %arg2[%c1, %c0_5, %c0_6] : memref<5x32x168xf32, #tpu.memory_space<vmem>>, vector<1x32x168xf32>
    %8 = vector.shape_cast %7 : vector<1x32x168xf32> to vector<32x168xf32>
    %cst_7 = arith.constant dense<0.000000e+00> : vector<28x168xf32>
    %9 = tpu.matmul %6, %8, %cst_7 {dimension_numbers = #tpu.dot_dimension_numbers<[1], [0], [0], [1], [0, 0, 1, 1], [], []>} : vector<28x32xf32>, vector<32x168xf32>, vector<28x168xf32> -> vector<28x168xf32>
    %10 = arith.addf %5, %9 : vector<28x168xf32>
    %11 = vector.extract_strided_slice %1 {offsets = [2, 0], sizes = [28, 32], strides = [1, 1]} : vector<32x32xf32> to vector<28x32xf32>
    %c2 = arith.constant 2 : index
    %c0_8 = arith.constant 0 : index
    %c0_9 = arith.constant 0 : index
    %12 = vector.load %arg2[%c2, %c0_8, %c0_9] : memref<5x32x168xf32, #tpu.memory_space<vmem>>, vector<1x32x168xf32>
    %13 = vector.shape_cast %12 : vector<1x32x168xf32> to vector<32x168xf32>
    %cst_10 = arith.constant dense<0.000000e+00> : vector<28x168xf32>
    %14 = tpu.matmul %11, %13, %cst_10 {dimension_numbers = #tpu.dot_dimension_numbers<[1], [0], [0], [1], [0, 0, 1, 1], [], []>} : vector<28x32xf32>, vector<32x168xf32>, vector<28x168xf32> -> vector<28x168xf32>
    %15 = arith.addf %10, %14 : vector<28x168xf32>
    %16 = vector.extract_strided_slice %1 {offsets = [3, 0], sizes = [28, 32], strides = [1, 1]} : vector<32x32xf32> to vector<28x32xf32>
    %c3 = arith.constant 3 : index
    %c0_11 = arith.constant 0 : index
    %c0_12 = arith.constant 0 : index
    %17 = vector.load %arg2[%c3, %c0_11, %c0_12] : memref<5x32x168xf32, #tpu.memory_space<vmem>>, vector<1x32x168xf32>
    %18 = vector.shape_cast %17 : vector<1x32x168xf32> to vector<32x168xf32>
    %cst_13 = arith.constant dense<0.000000e+00> : vector<28x168xf32>
    %19 = tpu.matmul %16, %18, %cst_13 {dimension_numbers = #tpu.dot_dimension_numbers<[1], [0], [0], [1], [0, 0, 1, 1], [], []>} : vector<28x32xf32>, vector<32x168xf32>, vector<28x168xf32> -> vector<28x168xf32>
    %20 = arith.addf %15, %19 : vector<28x168xf32>
    %21 = vector.extract_strided_slice %1 {offsets = [4, 0], sizes = [28, 32], strides = [1, 1]} : vector<32x32xf32> to vector<28x32xf32>
    %c4 = arith.constant 4 : index
    %c0_14 = arith.constant 0 : index
    %c0_15 = arith.constant 0 : index
    %22 = vector.load %arg2[%c4, %c0_14, %c0_15] : memref<5x32x168xf32, #tpu.memory_space<vmem>>, vector<1x32x168xf32>
    %23 = vector.shape_cast %22 : vector<1x32x168xf32> to vector<32x168xf32>
    %cst_16 = arith.constant dense<0.000000e+00> : vector<28x168xf32>
    %24 = tpu.matmul %21, %23, %cst_16 {dimension_numbers = #tpu.dot_dimension_numbers<[1], [0], [0], [1], [0, 0, 1, 1], [], []>} : vector<28x32xf32>, vector<32x168xf32>, vector<28x168xf32> -> vector<28x168xf32>
    %25 = arith.addf %20, %24 : vector<28x168xf32>
    %c0_17 = arith.constant 0 : index
    %c0_18 = arith.constant 0 : index
    %26 = vector.load %arg3[%c0_17, %c0_18] : memref<1x168xf32, #tpu.memory_space<vmem>>, vector<1x168xf32>
    %27 = vector.broadcast %26 : vector<1x168xf32> to vector<28x168xf32>
    %28 = arith.addf %25, %27 : vector<28x168xf32>
    %29 = math.tanh %28 : vector<28x168xf32>
    %c0_19 = arith.constant 0 : index
    %c0_20 = arith.constant 0 : index
    %30 = vector.load %arg4[%c0_19, %c0_20] : memref<14x28xf32, #tpu.memory_space<vmem>>, vector<14x28xf32>
    %cst_21 = arith.constant dense<0.000000e+00> : vector<14x168xf32>
    %31 = tpu.matmul %30, %29, %cst_21 {dimension_numbers = #tpu.dot_dimension_numbers<[1], [0], [0], [1], [0, 0, 1, 1], [], []>} : vector<14x28xf32>, vector<28x168xf32>, vector<14x168xf32> -> vector<14x168xf32>
    %c0_22 = arith.constant 0 : index
    %c0_23 = arith.constant 0 : index
    %32 = vector.load %arg5[%c0_22, %c0_23] : memref<168x84xf32, #tpu.memory_space<vmem>>, vector<168x84xf32>
    %cst_24 = arith.constant dense<0.000000e+00> : vector<14x84xf32>
    %33 = tpu.matmul %31, %32, %cst_24 {dimension_numbers = #tpu.dot_dimension_numbers<[1], [0], [0], [1], [0, 0, 1, 1], [], []>} : vector<14x168xf32>, vector<168x84xf32>, vector<14x84xf32> -> vector<14x84xf32>
    %34 = vector.extract_strided_slice %33 {offsets = [0, 0], sizes = [10, 84], strides = [1, 1]} : vector<14x84xf32> to vector<10x84xf32>
    %c0_25 = arith.constant 0 : index
    %c0_26 = arith.constant 0 : index
    %c0_27 = arith.constant 0 : index
    %35 = vector.load %arg6[%c0_25, %c0_26, %c0_27] : memref<5x84x160xf32, #tpu.memory_space<vmem>>, vector<1x84x160xf32>
    %36 = vector.shape_cast %35 : vector<1x84x160xf32> to vector<84x160xf32>
    %cst_28 = arith.constant dense<0.000000e+00> : vector<10x160xf32>
    %37 = tpu.matmul %34, %36, %cst_28 {dimension_numbers = #tpu.dot_dimension_numbers<[1], [0], [0], [1], [0, 0, 1, 1], [], []>} : vector<10x84xf32>, vector<84x160xf32>, vector<10x160xf32> -> vector<10x160xf32>
    %38 = vector.extract_strided_slice %33 {offsets = [1, 0], sizes = [10, 84], strides = [1, 1]} : vector<14x84xf32> to vector<10x84xf32>
    %c1_29 = arith.constant 1 : index
    %c0_30 = arith.constant 0 : index
    %c0_31 = arith.constant 0 : index
    %39 = vector.load %arg6[%c1_29, %c0_30, %c0_31] : memref<5x84x160xf32, #tpu.memory_space<vmem>>, vector<1x84x160xf32>
    %40 = vector.shape_cast %39 : vector<1x84x160xf32> to vector<84x160xf32>
    %cst_32 = arith.constant dense<0.000000e+00> : vector<10x160xf32>
    %41 = tpu.matmul %38, %40, %cst_32 {dimension_numbers = #tpu.dot_dimension_numbers<[1], [0], [0], [1], [0, 0, 1, 1], [], []>} : vector<10x84xf32>, vector<84x160xf32>, vector<10x160xf32> -> vector<10x160xf32>
    %42 = arith.addf %37, %41 : vector<10x160xf32>
    %43 = vector.extract_strided_slice %33 {offsets = [2, 0], sizes = [10, 84], strides = [1, 1]} : vector<14x84xf32> to vector<10x84xf32>
    %c2_33 = arith.constant 2 : index
    %c0_34 = arith.constant 0 : index
    %c0_35 = arith.constant 0 : index
    %44 = vector.load %arg6[%c2_33, %c0_34, %c0_35] : memref<5x84x160xf32, #tpu.memory_space<vmem>>, vector<1x84x160xf32>
    %45 = vector.shape_cast %44 : vector<1x84x160xf32> to vector<84x160xf32>
    %cst_36 = arith.constant dense<0.000000e+00> : vector<10x160xf32>
    %46 = tpu.matmul %43, %45, %cst_36 {dimension_numbers = #tpu.dot_dimension_numbers<[1], [0], [0], [1], [0, 0, 1, 1], [], []>} : vector<10x84xf32>, vector<84x160xf32>, vector<10x160xf32> -> vector<10x160xf32>
    %47 = arith.addf %42, %46 : vector<10x160xf32>
    %48 = vector.extract_strided_slice %33 {offsets = [3, 0], sizes = [10, 84], strides = [1, 1]} : vector<14x84xf32> to vector<10x84xf32>
    %c3_37 = arith.constant 3 : index
    %c0_38 = arith.constant 0 : index
    %c0_39 = arith.constant 0 : index
    %49 = vector.load %arg6[%c3_37, %c0_38, %c0_39] : memref<5x84x160xf32, #tpu.memory_space<vmem>>, vector<1x84x160xf32>
    %50 = vector.shape_cast %49 : vector<1x84x160xf32> to vector<84x160xf32>
    %cst_40 = arith.constant dense<0.000000e+00> : vector<10x160xf32>
    %51 = tpu.matmul %48, %50, %cst_40 {dimension_numbers = #tpu.dot_dimension_numbers<[1], [0], [0], [1], [0, 0, 1, 1], [], []>} : vector<10x84xf32>, vector<84x160xf32>, vector<10x160xf32> -> vector<10x160xf32>
    %52 = arith.addf %47, %51 : vector<10x160xf32>
    %53 = vector.extract_strided_slice %33 {offsets = [4, 0], sizes = [10, 84], strides = [1, 1]} : vector<14x84xf32> to vector<10x84xf32>
    %c4_41 = arith.constant 4 : index
    %c0_42 = arith.constant 0 : index
    %c0_43 = arith.constant 0 : index
    %54 = vector.load %arg6[%c4_41, %c0_42, %c0_43] : memref<5x84x160xf32, #tpu.memory_space<vmem>>, vector<1x84x160xf32>
    %55 = vector.shape_cast %54 : vector<1x84x160xf32> to vector<84x160xf32>
    %cst_44 = arith.constant dense<0.000000e+00> : vector<10x160xf32>
    %56 = tpu.matmul %53, %55, %cst_44 {dimension_numbers = #tpu.dot_dimension_numbers<[1], [0], [0], [1], [0, 0, 1, 1], [], []>} : vector<10x84xf32>, vector<84x160xf32>, vector<10x160xf32> -> vector<10x160xf32>
    %57 = arith.addf %52, %56 : vector<10x160xf32>
    %c0_45 = arith.constant 0 : index
    %c0_46 = arith.constant 0 : index
    %58 = vector.load %arg7[%c0_45, %c0_46] : memref<1x160xf32, #tpu.memory_space<vmem>>, vector<1x160xf32>
    %59 = vector.broadcast %58 : vector<1x160xf32> to vector<10x160xf32>
    %60 = arith.addf %57, %59 : vector<10x160xf32>
    %61 = math.tanh %60 : vector<10x160xf32>
    %c0_47 = arith.constant 0 : index
    %c0_48 = arith.constant 0 : index
    %62 = vector.load %arg8[%c0_47, %c0_48] : memref<5x10xf32, #tpu.memory_space<vmem>>, vector<5x10xf32>
    %cst_49 = arith.constant dense<0.000000e+00> : vector<5x160xf32>
    %63 = tpu.matmul %62, %61, %cst_49 {dimension_numbers = #tpu.dot_dimension_numbers<[1], [0], [0], [1], [0, 0, 1, 1], [], []>} : vector<5x10xf32>, vector<10x160xf32>, vector<5x160xf32> -> vector<5x160xf32>
    %c0_50 = arith.constant 0 : index
    %c0_51 = arith.constant 0 : index
    %64 = vector.load %arg9[%c0_50, %c0_51] : memref<160x80xf32, #tpu.memory_space<vmem>>, vector<160x80xf32>
    %cst_52 = arith.constant dense<0.000000e+00> : vector<5x80xf32>
    %65 = tpu.matmul %63, %64, %cst_52 {dimension_numbers = #tpu.dot_dimension_numbers<[1], [0], [0], [1], [0, 0, 1, 1], [], []>} : vector<5x160xf32>, vector<160x80xf32>, vector<5x80xf32> -> vector<5x80xf32>
    %66 = vector.extract_strided_slice %65 {offsets = [0, 0], sizes = [1, 80], strides = [1, 1]} : vector<5x80xf32> to vector<1x80xf32>
    %c0_53 = arith.constant 0 : index
    %c0_54 = arith.constant 0 : index
    %c0_55 = arith.constant 0 : index
    %67 = vector.load %arg10[%c0_53, %c0_54, %c0_55] : memref<5x80x120xf32, #tpu.memory_space<vmem>>, vector<1x80x120xf32>
    %68 = vector.shape_cast %67 : vector<1x80x120xf32> to vector<80x120xf32>
    %cst_56 = arith.constant dense<0.000000e+00> : vector<1x120xf32>
    %69 = tpu.matmul %66, %68, %cst_56 {dimension_numbers = #tpu.dot_dimension_numbers<[1], [0], [0], [1], [0, 0, 1, 1], [], []>} : vector<1x80xf32>, vector<80x120xf32>, vector<1x120xf32> -> vector<1x120xf32>
    %70 = vector.extract_strided_slice %65 {offsets = [1, 0], sizes = [1, 80], strides = [1, 1]} : vector<5x80xf32> to vector<1x80xf32>
    %c1_57 = arith.constant 1 : index
    %c0_58 = arith.constant 0 : index
    %c0_59 = arith.constant 0 : index
    %71 = vector.load %arg10[%c1_57, %c0_58, %c0_59] : memref<5x80x120xf32, #tpu.memory_space<vmem>>, vector<1x80x120xf32>
    %72 = vector.shape_cast %71 : vector<1x80x120xf32> to vector<80x120xf32>
    %cst_60 = arith.constant dense<0.000000e+00> : vector<1x120xf32>
    %73 = tpu.matmul %70, %72, %cst_60 {dimension_numbers = #tpu.dot_dimension_numbers<[1], [0], [0], [1], [0, 0, 1, 1], [], []>} : vector<1x80xf32>, vector<80x120xf32>, vector<1x120xf32> -> vector<1x120xf32>
    %74 = arith.addf %69, %73 : vector<1x120xf32>
    %75 = vector.extract_strided_slice %65 {offsets = [2, 0], sizes = [1, 80], strides = [1, 1]} : vector<5x80xf32> to vector<1x80xf32>
    %c2_61 = arith.constant 2 : index
    %c0_62 = arith.constant 0 : index
    %c0_63 = arith.constant 0 : index
    %76 = vector.load %arg10[%c2_61, %c0_62, %c0_63] : memref<5x80x120xf32, #tpu.memory_space<vmem>>, vector<1x80x120xf32>
    %77 = vector.shape_cast %76 : vector<1x80x120xf32> to vector<80x120xf32>
    %cst_64 = arith.constant dense<0.000000e+00> : vector<1x120xf32>
    %78 = tpu.matmul %75, %77, %cst_64 {dimension_numbers = #tpu.dot_dimension_numbers<[1], [0], [0], [1], [0, 0, 1, 1], [], []>} : vector<1x80xf32>, vector<80x120xf32>, vector<1x120xf32> -> vector<1x120xf32>
    %79 = arith.addf %74, %78 : vector<1x120xf32>
    %80 = vector.extract_strided_slice %65 {offsets = [3, 0], sizes = [1, 80], strides = [1, 1]} : vector<5x80xf32> to vector<1x80xf32>
    %c3_65 = arith.constant 3 : index
    %c0_66 = arith.constant 0 : index
    %c0_67 = arith.constant 0 : index
    %81 = vector.load %arg10[%c3_65, %c0_66, %c0_67] : memref<5x80x120xf32, #tpu.memory_space<vmem>>, vector<1x80x120xf32>
    %82 = vector.shape_cast %81 : vector<1x80x120xf32> to vector<80x120xf32>
    %cst_68 = arith.constant dense<0.000000e+00> : vector<1x120xf32>
    %83 = tpu.matmul %80, %82, %cst_68 {dimension_numbers = #tpu.dot_dimension_numbers<[1], [0], [0], [1], [0, 0, 1, 1], [], []>} : vector<1x80xf32>, vector<80x120xf32>, vector<1x120xf32> -> vector<1x120xf32>
    %84 = arith.addf %79, %83 : vector<1x120xf32>
    %85 = vector.extract_strided_slice %65 {offsets = [4, 0], sizes = [1, 80], strides = [1, 1]} : vector<5x80xf32> to vector<1x80xf32>
    %c4_69 = arith.constant 4 : index
    %c0_70 = arith.constant 0 : index
    %c0_71 = arith.constant 0 : index
    %86 = vector.load %arg10[%c4_69, %c0_70, %c0_71] : memref<5x80x120xf32, #tpu.memory_space<vmem>>, vector<1x80x120xf32>
    %87 = vector.shape_cast %86 : vector<1x80x120xf32> to vector<80x120xf32>
    %cst_72 = arith.constant dense<0.000000e+00> : vector<1x120xf32>
    %88 = tpu.matmul %85, %87, %cst_72 {dimension_numbers = #tpu.dot_dimension_numbers<[1], [0], [0], [1], [0, 0, 1, 1], [], []>} : vector<1x80xf32>, vector<80x120xf32>, vector<1x120xf32> -> vector<1x120xf32>
    %89 = arith.addf %84, %88 : vector<1x120xf32>
    %c0_73 = arith.constant 0 : index
    %c0_74 = arith.constant 0 : index
    %90 = vector.load %arg11[%c0_73, %c0_74] : memref<1x120xf32, #tpu.memory_space<vmem>>, vector<1x120xf32>
    %91 = arith.addf %89, %90 : vector<1x120xf32>
    %92 = math.tanh %91 : vector<1x120xf32>
    %c0_75 = arith.constant 0 : index
    %c0_76 = arith.constant 0 : index
    %93 = vector.load %arg12[%c0_75, %c0_76] : memref<120x84xf32, #tpu.memory_space<vmem>>, vector<120x84xf32>
    %cst_77 = arith.constant dense<0.000000e+00> : vector<1x84xf32>
    %94 = tpu.matmul %92, %93, %cst_77 {dimension_numbers = #tpu.dot_dimension_numbers<[1], [0], [0], [1], [0, 0, 1, 1], [], []>} : vector<1x120xf32>, vector<120x84xf32>, vector<1x84xf32> -> vector<1x84xf32>
    %c0_78 = arith.constant 0 : index
    %c0_79 = arith.constant 0 : index
    %95 = vector.load %arg13[%c0_78, %c0_79] : memref<1x84xf32, #tpu.memory_space<vmem>>, vector<1x84xf32>
    %96 = arith.addf %94, %95 : vector<1x84xf32>
    %97 = math.tanh %96 : vector<1x84xf32>
    %c0_80 = arith.constant 0 : index
    %c0_81 = arith.constant 0 : index
    %98 = vector.load %arg14[%c0_80, %c0_81] : memref<84x10xf32, #tpu.memory_space<vmem>>, vector<84x10xf32>
    %cst_82 = arith.constant dense<0.000000e+00> : vector<1x10xf32>
    %99 = tpu.matmul %97, %98, %cst_82 {dimension_numbers = #tpu.dot_dimension_numbers<[1], [0], [0], [1], [0, 0, 1, 1], [], []>} : vector<1x84xf32>, vector<84x10xf32>, vector<1x10xf32> -> vector<1x10xf32>
    %c0_83 = arith.constant 0 : index
    %c0_84 = arith.constant 0 : index
    %100 = vector.load %arg15[%c0_83, %c0_84] : memref<1x10xf32, #tpu.memory_space<vmem>>, vector<1x10xf32>
    %101 = arith.addf %99, %100 : vector<1x10xf32>
    %c0_85 = arith.constant 0 : index
    %c0_86 = arith.constant 0 : index
    %c0_87 = arith.constant 0 : index
    %102 = vector.load %arg16[%c0_85, %c0_86, %c0_87] : memref<1x1x10xf32, #tpu.memory_space<vmem>>, vector<1x1x10xf32>
    %103 = vector.shape_cast %102 : vector<1x1x10xf32> to vector<1x10xf32>
    %104 = vector.shape_cast %101 : vector<1x10xf32> to vector<1x1x10xf32>
    tpu.vector_store %arg16[%c0_85, %c0_86, %c0_87], %104 {strides = array<i32>} : memref<1x1x10xf32, #tpu.memory_space<vmem>>, vector<1x1x10xf32>,
    return
  }
  func.func @transform_0(%arg0: i32) -> (i32, i32, i32) {
    %c0_i32 = arith.constant 0 : i32
    %c0_i32_0 = arith.constant 0 : i32
    %c0_i32_1 = arith.constant 0 : i32
    return %arg0, %c0_i32, %c0_i32_0 : i32, i32, i32
  }
  func.func @transform_1(%arg0: i32) -> (i32, i32, i32) {
    %c0_i32 = arith.constant 0 : i32
    %c0_i32_0 = arith.constant 0 : i32
    %c0_i32_1 = arith.constant 0 : i32
    %c0_i32_2 = arith.constant 0 : i32
    return %c0_i32, %c0_i32_0, %c0_i32_1 : i32, i32, i32
  }
  func.func @transform_2(%arg0: i32) -> (i32, i32) {
    %c0_i32 = arith.constant 0 : i32
    %c0_i32_0 = arith.constant 0 : i32
    %c0_i32_1 = arith.constant 0 : i32
    return %c0_i32, %c0_i32_0 : i32, i32
  }
  func.func @transform_3(%arg0: i32) -> (i32, i32) {
    %c0_i32 = arith.constant 0 : i32
    %c0_i32_0 = arith.constant 0 : i32
    %c0_i32_1 = arith.constant 0 : i32
    return %c0_i32, %c0_i32_0 : i32, i32
  }
  func.func @transform_4(%arg0: i32) -> (i32, i32) {
    %c0_i32 = arith.constant 0 : i32
    %c0_i32_0 = arith.constant 0 : i32
    %c0_i32_1 = arith.constant 0 : i32
    return %c0_i32, %c0_i32_0 : i32, i32
  }
  func.func @transform_5(%arg0: i32) -> (i32, i32, i32) {
    %c0_i32 = arith.constant 0 : i32
    %c0_i32_0 = arith.constant 0 : i32
    %c0_i32_1 = arith.constant 0 : i32
    %c0_i32_2 = arith.constant 0 : i32
    return %c0_i32, %c0_i32_0, %c0_i32_1 : i32, i32, i32
  }
  func.func @transform_6(%arg0: i32) -> (i32, i32) {
    %c0_i32 = arith.constant 0 : i32
    %c0_i32_0 = arith.constant 0 : i32
    %c0_i32_1 = arith.constant 0 : i32
    return %c0_i32, %c0_i32_0 : i32, i32
  }
  func.func @transform_7(%arg0: i32) -> (i32, i32) {
    %c0_i32 = arith.constant 0 : i32
    %c0_i32_0 = arith.constant 0 : i32
    %c0_i32_1 = arith.constant 0 : i32
    return %c0_i32, %c0_i32_0 : i32, i32
  }
  func.func @transform_8(%arg0: i32) -> (i32, i32) {
    %c0_i32 = arith.constant 0 : i32
    %c0_i32_0 = arith.constant 0 : i32
    %c0_i32_1 = arith.constant 0 : i32
    return %c0_i32, %c0_i32_0 : i32, i32
  }
  func.func @transform_9(%arg0: i32) -> (i32, i32, i32) {
    %c0_i32 = arith.constant 0 : i32
    %c0_i32_0 = arith.constant 0 : i32
    %c0_i32_1 = arith.constant 0 : i32
    %c0_i32_2 = arith.constant 0 : i32
    return %c0_i32, %c0_i32_0, %c0_i32_1 : i32, i32, i32
  }
  func.func @transform_10(%arg0: i32) -> (i32, i32) {
    %c0_i32 = arith.constant 0 : i32
    %c0_i32_0 = arith.constant 0 : i32
    %c0_i32_1 = arith.constant 0 : i32
    return %c0_i32, %c0_i32_0 : i32, i32
  }
  func.func @transform_11(%arg0: i32) -> (i32, i32) {
    %c0_i32 = arith.constant 0 : i32
    %c0_i32_0 = arith.constant 0 : i32
    %c0_i32_1 = arith.constant 0 : i32
    return %c0_i32, %c0_i32_0 : i32, i32
  }
  func.func @transform_12(%arg0: i32) -> (i32, i32) {
    %c0_i32 = arith.constant 0 : i32
    %c0_i32_0 = arith.constant 0 : i32
    %c0_i32_1 = arith.constant 0 : i32
    return %c0_i32, %c0_i32_0 : i32, i32
  }
  func.func @transform_13(%arg0: i32) -> (i32, i32) {
    %c0_i32 = arith.constant 0 : i32
    %c0_i32_0 = arith.constant 0 : i32
    %c0_i32_1 = arith.constant 0 : i32
    return %c0_i32, %c0_i32_0 : i32, i32
  }
  func.func @transform_14(%arg0: i32) -> (i32, i32) {
    %c0_i32 = arith.constant 0 : i32
    %c0_i32_0 = arith.constant 0 : i32
    %c0_i32_1 = arith.constant 0 : i32
    return %c0_i32, %c0_i32_0 : i32, i32
  }
  func.func @transform_15(%arg0: i32) -> (i32, i32, i32) {
    %c0_i32 = arith.constant 0 : i32
    %c0_i32_0 = arith.constant 0 : i32
    %c0_i32_1 = arith.constant 0 : i32
    return %arg0, %c0_i32, %c0_i32_0 : i32, i32, i32
  }
}

</mosaic_0001>

<bundles_post_ra>
// kernel: lenet5_forward.1
= control target key start
LH: loop header
LB: loop body
LE: loop exit
PB: predicated region body
PF: predicated region fallthrough
CT: control target
= control target key end

     0   :  { %20 = vsyncpa [#allocation3], 0  ;;  %s4663_s0 = inlined_call_operand.vmem [shape: f32[2,32,32], index: 0, kind: input, shape index: {}]   ;;  %s4664_s1 = inlined_call_operand.vmem [shape: f32[5,32,168], index: 1, kind: input, shape index: {}]   ;;  %s4665_s2 = inlined_call_operand.vmem [shape: f32[1,168], index: 2, kind: input, shape index: {}]   ;;  %s4666_s3 = inlined_call_operand.vmem [shape: f32[14,28], index: 3, kind: input, shape index: {}]   ;;  %s4667_s4 = inlined_call_operand.vmem [shape: f32[168,84], index: 4, kind: input, shape index: {}]   ;;  %s4668_s5 = inlined_call_operand.vmem [shape: f32[5,84,160], index: 5, kind: input, shape index: {}]   ;;  %s4669_s6 = inlined_call_operand.vmem [shape: f32[1,160], index: 6, kind: input, shape index: {}]   ;;  %s4670_s7 = inlined_call_operand.vmem [shape: f32[5,10], index: 7, kind: input, shape index: {}]   ;;  %s4671_s8 = inlined_call_operand.vmem [shape: f32[160,80], index: 8, kind: input, shape index: {}]   ;;  %s4672_s9 = inlined_call_operand.vmem [shape: f32[5,80,120], index: 9, kind: input, shape index: {}]   ;;  %s4673_s10 = inlined_call_operand.vmem [shape: f32[1,120], index: 10, kind: input, shape index: {}]   ;;  %s4674_s11 = inlined_call_operand.vmem [shape: f32[120,84], index: 11, kind: input, shape index: {}]   ;;  %s4675_s12 = inlined_call_operand.vmem [shape: f32[1,84], index: 12, kind: input, shape index: {}]   ;;  %s4676_s13 = inlined_call_operand.vmem [shape: f32[84,10], index: 13, kind: input, shape index: {}]   ;;  %s4677_s14 = inlined_call_operand.vmem [shape: f32[1,10], index: 14, kind: input, shape index: {}]   ;;  %s4678_s15 = inlined_call_operand.hbm [shape: f32[2,1,10], index: 15, kind: output, shape index: {}]  }
   0x1   :  { %22 = vsyncpa [#allocation3 + $0x1], 0  ;;  %s3454_s18 = smov 0   ;;  %s3456_s19 = smov 0  }
   0x2   :  { %s3458_s20 = smov 0   ;;  %s3460_s21 = smov 0  }
   0x3 LB: > { %4685 = sst [smem:[#allocation5_spill]] %s3357_s18  ;;  %s3475_s22 = sadd.s32 4294967295, %s3369_s21   ;;  %s3369_s21 = sphi %s3460_s21, %s4696_s21   ;;  %s3365_s20 = sphi %s3458_s20, %s4698_s20   ;;  %s3361_s19 = sphi %s3456_s19, %s4700_s19   ;;  %s3357_s18 = sphi %s3454_s18, %s4699_s18  }
   0x4   : > { %4686 = sst [smem:[#allocation6_spill]] %s3365_s20  ;;  %s2756_s23 = sadd.s32 4294967294, %s3369_s21  }
   0x5   : > { %4687 = sst [smem:[#allocation7_spill]] %s3369_s21  ;;  %s3479_s24 = sadd.s32 1, %s3369_s21  }
   0x6   : > { %4688 = sst [smem:[#allocation8_spill]] %s3479_s24  ;;  %s355_s25 = sadd.s32 1, %s3365_s20 }
   0x7   : > { %s352_s26 = ssub.s32 %s3369_s21, %s3479_s24  ;;  %p365_p0 = scmp.ne.s32.totalorder %s3365_s20, %s3361_s19 }
   0x8   : > { %p353_p1 = scmp.eq.s32.totalorder %s352_s26, 0  ;;  %p366_p2 = scmp.eq.s32.totalorder %s3475_s22, 1 }
   0x9   : > { %p371_p3 = scmp.ne.s32.totalorder %s3361_s19, %s3357_s18  ;;  %p372_p4 = scmp.eq.s32.totalorder %s2756_s23, 1 }
   0xa   : > { %s3490_s27 = scalar_select %p353_p1, %s3365_s20, %s355_s25  }
   0xb   : > { %p3492_p5 = por %p366_p2, %p365_p0  ;;  %p3496_p6 = por %p372_p4, %p371_p3 }
   0xc   : > { %4689 = sst [smem:[#allocation9_spill]] %s3490_s27  ;;  %p2759_p7 = scmp.ge.s32.totalorder %s3369_s21, 1 }
   0xd   : > { %s4691_s29 = scalar_select %p3496_p6, 1, 0 }
   0xe   : > { %p440_p8 = scmp.lt.s32.totalorder %s3369_s21, 3 }
   0xf   : > { %4692 = sst [smem:[#allocation10_spill]] %s4691_s29 }
  0x10   : > { %p441_p9 = pnand %p2759_p7, %p440_p8 }
  0x11   : > { %p487_p10 = scmp.lt.s32.totalorder (!%p441_p9), %s3475_s22, 1  ;;  %s485_s21 = sand.u32 (!%p441_p9), 1, %s3361_s19  }
  0x12   : > { %444 = sbr.rel (%p441_p9) target bundleno = 2026 (0x7ea), region = 80  ;;  %s2980_s20 = sshll.u32 (!%p441_p9), %s3475_s22, 4 }
  0x13   : > { %s486_s27 = scalar_lea.vmem (!%p441_p9), [#allocation2], %s485_s21  ;;  %s4628_s16 = scalar_lea.hbm (!%p441_p9), %s4678_s15, %s2980_s20 }
  0x14   : > { %s2689_s17 = scalar_lea.sflag (!%p441_p9), [#allocation3], %s485_s21 }
  0x17   : > { %v2769_v0 = vld [vmem:[%s4664_s1 + $0x78] sm:$0xff]  ;;  %v2768_v2 = vld [vmem:[%s4664_s1 + $0x70] sm:$0xff]  ;;  %v2767_v4 = vld [vmem:[%s4664_s1 + $0x68] sm:$0xff]  ;;  %s488_s24 = scalar_select %p487_p10, %s3475_s22, 1  ;;  %vm517_vm0 = vcmask 1046528   ;;  %vm525_vm1 = vcmask 261120  }
  0x18   : > { %v503_v1 = vld [vmem:[%s4664_s1 + $0x38] sm:$0xff]  ;;  %558 = vmatprep.subr.mxu0 %v2769_v0  ;;  %v502_v3 = vld [vmem:[%s4664_s1 + $0x30] sm:$0xff]  ;;  %v501_v5 = vld [vmem:[%s4664_s1 + $0x28] sm:$0xff]  ;;  %v3371_v22 = vmov 0.0   ;;  %vm729_vm2 = vcmask 1045504   ;;  %vm851_vm3 = vcmask 1044480  }
  0x19   : > { %655 = vmatprep.subr.mxu1 %v503_v1  ;;  %559 = vmatpush1.msra.mxu0 %v2768_v2  ;;  %v2766_v6 = vld [vmem:[%s4664_s1 + $0x60] sm:$0xff]  ;;  %v2765_v8 = vld [vmem:[%s4664_s1 + $0x58] sm:$0xff]  ;;  %v2764_v10 = vld [vmem:[%s4664_s1 + $0x50] sm:$0xff]  ;;  %s2983_s30 = sshll.u32 %s488_s24, 5  ;;  %vm973_vm4 = vcmask 1043456   ;;  %vm1116_vm5 = vcmask 228352  }
  0x1a   : > { %656 = vmatpush1.msra.mxu1 %v502_v3  ;;  %v500_v7 = vld [vmem:[%s4664_s1 + $0x20] sm:$0xff]  ;;  %560 = vmatprep.subr.mxu0 %v2767_v4  ;;  %v499_v9 = vld [vmem:[%s4664_s1 + $0x18] sm:$0xff]  ;;  %v498_v11 = vld [vmem:[%s4664_s1 + $0x10] sm:$0xff]  ;;  %s491_s25 = scalar_lea.vmem %s4663_s0, %s2983_s30  ;;  %vm1227_vm6 = vcmask 326656   ;;  %vm1359_vm7 = vcmask 687104   ;;  %vm1910_vm8 = vcmask 1041408  }
  0x1b   : > { %657 = vmatprep.subr.mxu1 %v501_v5  ;;  %561 = vmatpush1.msra.mxu0 %v2766_v6  ;;  %v2763_v12 = vld [vmem:[%s4664_s1 + $0x48] sm:$0xff]  ;;  %v2762_v14 = vld [vmem:[%s4664_s1 + $0x40] sm:$0xff]  ;;  %v3559_v18 = vld [vmem:[%s491_s25 + $0x10] sm:$0xff]  ;;  %vm1906_vm9 = vcmask 80896   ;;  %vm3372_vm10 = vmmov 0   ;;  %vm2104_vm11 = vcmask 654336  }
  0x1c   : > { %658 = vmatpush1.msra.mxu1 %v500_v7  ;;  %v497_v13 = vld [vmem:[%s4664_s1 + $0x8] sm:$0xff]  ;;  %562 = vmatprep.subr.mxu0 %v2765_v8  ;;  %v496_v15 = vld [vmem:[%s4664_s1] sm:$0xff]  ;;  %v521_v21 = vrot.slane %v3559_v18, 1  ;;  %v3565_v23 = vld [vmem:[%s491_s25 + $0x18] sm:$0xff]  ;;  %v733_v50 = vrot.slane %v3559_v18, 2  ;;  %v855_v51 = vrot.slane %v3559_v18, 3 }
  0x1d   : > { %659 = vmatprep.subr.mxu1 %v499_v9  ;;  %563 = vmatpush1.msra.mxu0 %v2764_v10  ;;  %v3555_v16 = vld [vmem:[%s491_s25] sm:$0xff]  ;;  %v3557_v17 = vld [vmem:[%s491_s25 + $0x8] sm:$0xff]  ;;  %v2785_v25 = vld [vmem:[%s4664_s1 + $0xb8] sm:$0xff]  ;;  %v523_v30 = vrot.slane %v3565_v23, 1  ;;  %v735_v56 = vrot.slane %v3565_v23, 2  ;;  %v857_v57 = vrot.slane %v3565_v23, 3 }
  0x1e   : > { %660 = vmatpush1.msra.mxu1 %v498_v11  ;;  %564 = vmatprep.subr.mxu0 %v2763_v12  ;;  %v518_v19 = vrot.slane %v3555_v16, 1  ;;  %v519_v20 = vrot.slane %v3557_v17, 1  ;;  %v2797_v26 = vld [vmem:[%s4664_s1 + $0xf8] sm:$0xff]  ;;  %v2784_v27 = vld [vmem:[%s4664_s1 + $0xb0] sm:$0xff]  ;;  %v2783_v31 = vld [vmem:[%s4664_s1 + $0xa8] sm:$0xff]  ;;  %v730_v40 = vrot.slane %v3555_v16, 2 }
  0x1f   : > { %661 = vmatprep.subr.mxu1 %v497_v13  ;;  %565 = vmatpush1.msra.mxu0 %v2762_v14  ;;  %v2796_v28 = vld [vmem:[%s4664_s1 + $0xf0] sm:$0xff]  ;;  %v2795_v32 = vld [vmem:[%s4664_s1 + $0xe8] sm:$0xff]  ;;  %v2782_v33 = vld [vmem:[%s4664_s1 + $0xa0] sm:$0xff]  ;;  %v524_v35 = vsel %vm517_vm0, %v521_v21, %v523_v30  ;;  %v731_v41 = vrot.slane %v3557_v17, 2  ;;  %v852_v42 = vrot.slane %v3555_v16, 3  ;;  %v853_v43 = vrot.slane %v3557_v17, 3 }
  0x20   : > { %598 = vmatprep.mubr.f32.mxu0 %v3371_v22  ;;  %662 = vmatpush1.msra.mxu1 %v496_v15  ;;  %v520_v24 = vsel %vm517_vm0, %v518_v19, %v519_v20  ;;  %v522_v29 = vsel %vm517_vm0, %v519_v20, %v521_v21  ;;  %v2794_v34 = vld [vmem:[%s4664_s1 + $0xe0] sm:$0xff]  ;;  %v2781_v36 = vld [vmem:[%s4664_s1 + $0x98] sm:$0xff]  ;;  %v2780_v38 = vld [vmem:[%s4664_s1 + $0x90] sm:$0xff]  ;;  %v736_v60 = vsel %vm729_vm2, %v733_v50, %v735_v56  ;;  %v974_v1 = vrot.slane %v3555_v16, 4  ;;  %s2701_s30 = sshll.u32 %s486_s27, 4  ;;  %s3373_s22 = smov [#allocation2]   ;;  %s2702_s30 = int_to_ptr.vmem [resolvable:$true] %s2701_s30 }
  0x21   : > { %695 = vmatprep.mubr.f32.mxu1 %v3371_v22  ;;  %2770 = vmatmul.mubr.msk.f32.vlgmr.msra.gmra.mxu0 %vm525_vm1, %v520_v24  ;;  %v2793_v37 = vld [vmem:[%s4664_s1 + $0xd8] sm:$0xff]  ;;  %v2792_v39 = vld [vmem:[%s4664_s1 + $0xd0] sm:$0xff]  ;;  %v2779_v44 = vld [vmem:[%s4664_s1 + $0x88] sm:$0xff]  ;;  %v732_v48 = vsel %vm729_vm2, %v730_v40, %v731_v41  ;;  %v854_v49 = vsel %vm851_vm3, %v852_v42, %v853_v43  ;;  %v734_v54 = vsel %vm729_vm2, %v731_v41, %v733_v50  ;;  %v975_v2 = vrot.slane %v3557_v17, 4  ;;  %s3309_s23 = scalar_lea.vmem %s2702_s30, 16  ;;  %s3313_s25 = sshll.u32 %s3373_s22, 4  ;;  %s3314_s25 = int_to_ptr.vmem [resolvable:$false] %s3313_s25 }
  0x22   : > { %2774 = vmatmul.mubr.msk.f32.vlgmr.msra.gmra.mxu1 %vm525_vm1, %v3555_v16  ;;  %604 = vmatprep.mubr.f32.mxu0 %v3371_v22  ;;  %v2778_v45 = vld [vmem:[%s4664_s1 + $0x80] sm:$0xff]  ;;  %v2791_v46 = vld [vmem:[%s4664_s1 + $0xc8] sm:$0xff]  ;;  %v2809_v52 = vld [vmem:[%s4664_s1 + $0x138] sm:$0xff]  ;;  %v856_v55 = vsel %vm851_vm3, %v853_v43, %v855_v51  ;;  %v858_v61 = vsel %vm851_vm3, %v855_v51, %v857_v57  ;;  %v977_v5 = vrot.slane %v3559_v18, 4  ;;  %v979_v7 = vrot.slane %v3565_v23, 4  ;;  %p3310_p11 = scmp.ne.s32.totalorder %s2702_s30, %s3309_s23  ;;  %s3315_s24 = scalar_lea.vmem %s3314_s25, 32 }
  0x23   : > { %701 = vmatprep.mubr.f32.mxu1 %v3371_v22  ;;  %769 = vmatprep.subr.mxu0 %v2785_v25  ;;  %v2790_v47 = vld [vmem:[%s4664_s1 + $0xc0] sm:$0xff]  ;;  %v2808_v53 = vld [vmem:[%s4664_s1 + $0x130] sm:$0xff]  ;;  %v2807_v58 = vld [vmem:[%s4664_s1 + $0x128] sm:$0xff]  ;;  %v976_v4 = vsel %vm973_vm4, %v974_v1, %v975_v2  ;;  %vm2523_vm12 = vcmask 982016   ;;  %vm2686_vm13 = vcmask 73728   ;;  %p3316_p0 = scmp.lt.s32.totalorder %s2702_s30, %s3314_s25  ;;  %p3317_p1 = scmp.lt.s32.totalorder %s3315_s24, %s3309_s23 }
  0x24   : > { %891 = vmatprep.subr.mxu1 %v2797_v26  ;;  %770 = vmatpush1.msra.mxu0 %v2784_v27  ;;  %v2806_v59 = vld [vmem:[%s4664_s1 + $0x120] sm:$0xff]  ;;  %v2805_v62 = vld [vmem:[%s4664_s1 + $0x118] sm:$0xff]  ;;  %v2804_v63 = vld [vmem:[%s4664_s1 + $0x110] sm:$0xff]  ;;  %v978_v6 = vsel %vm973_vm4, %v975_v2, %v977_v5  ;;  %v980_v8 = vsel %vm973_vm4, %v977_v5, %v979_v7  ;;  %p3311_p12 = pnand %p3310_p11, %p3492_p5 }
  0x25   : > { %892 = vmatpush1.msra.mxu1 %v2796_v28  ;;  %2771 = vmatmul.mubr.msk.f32.gmra.mxu0 %vm525_vm1, %v522_v29  ;;  %v2803_v0 = vld [vmem:[%s4664_s1 + $0x108] sm:$0xff]  ;;  %v2802_v3 = vld [vmem:[%s4664_s1 + $0x100] sm:$0xff]  ;;  %v1221_v9 = vld [vmem:[%s4667_s4 + $0x78] sm:$0xff]  ;;  %p3318_p2 = por %p3317_p1, %p3316_p0 }
  0x26   : > { %2775 = vmatmul.mubr.msk.f32.gmra.mxu1 %vm525_vm1, %v3557_v17  ;;  %610 = vmatprep.mubr.f32.mxu0 %v3371_v22  ;;  %v1220_v10 = vld [vmem:[%s4667_s4 + $0x70] sm:$0xff]  ;;  %v1219_v11 = vld [vmem:[%s4667_s4 + $0x68] sm:$0xff]  ;;  %v1218_v12 = vld [vmem:[%s4667_s4 + $0x60] sm:$0xff]  ;;  %p3312_p13 = pneg %p3311_p12 }
  0x27   : > { %707 = vmatprep.mubr.f32.mxu1 %v3371_v22  ;;  %771 = vmatprep.subr.mxu0 %v2783_v31  ;;  %v1217_v13 = vld [vmem:[%s4667_s4 + $0x58] sm:$0xff]  ;;  %v1216_v14 = vld [vmem:[%s4667_s4 + $0x50] sm:$0xff]  ;;  %v1215_v15 = vld [vmem:[%s4667_s4 + $0x48] sm:$0xff] }
  0x28   : > { %893 = vmatprep.subr.mxu1 %v2795_v32  ;;  %772 = vmatpush1.msra.mxu0 %v2782_v33  ;;  %v1214_v16 = vld [vmem:[%s4667_s4 + $0x40] sm:$0xff]  ;;  %v1213_v17 = vld [vmem:[%s4667_s4 + $0x38] sm:$0xff]  ;;  %v1211_v19 = vld [vmem:[%s4667_s4 + $0x28] sm:$0xff]  ;;  %p3319_p3 = pnand %p3318_p2, %p3312_p13 }
  0x29   : > { %894 = vmatpush1.msra.mxu1 %v2794_v34  ;;  %2772 = vmatmul.mubr.msk.f32.gmra.mxu0 %vm525_vm1, %v524_v35  ;;  %v1210_v20 = vld [vmem:[%s4667_s4 + $0x20] sm:$0xff]  ;;  %v1209_v21 = vld [vmem:[%s4667_s4 + $0x18] sm:$0xff]  ;;  %v1207_v24 = vld [vmem:[%s4667_s4 + $0x8] sm:$0xff] }
  0x2a   : > { %2776 = vmatmul.mubr.msk.f32.gmra.mxu1 %vm525_vm1, %v3559_v18  ;;  %616 = vmatprep.mubr.f32.mxu0 %v3371_v22  ;;  %v1212_v18 = vld [vmem:[%s4667_s4 + $0x30] sm:$0xff]  ;;  %v1206_v25 = vld [vmem:[%s4667_s4] sm:$0xff]  ;;  %v1225_v27 = vld [vmem:[%s4667_s4 + $0x98] sm:$0xff] }
  0x2b   : > { %713 = vmatprep.mubr.f32.mxu1 %v3371_v22  ;;  %773 = vmatprep.subr.mxu0 %v2781_v36  ;;  %v1226_v26 = vld [vmem:[%s4667_s4 + $0xa0] sm:$0xff]  ;;  %v1224_v28 = vld [vmem:[%s4667_s4 + $0x90] sm:$0xff] }
  0x2c   : > { %895 = vmatprep.subr.mxu1 %v2793_v37  ;;  %774 = vmatpush1.msra.mxu0 %v2780_v38 }
  0x2d   : > { %896 = vmatpush1.msra.mxu1 %v2792_v39  ;;  %2773 = vmatmul.mubr.msk.f32.gmra.mxu0 %vm525_vm1, %v523_v30 }
  0x2e   : > { %2777 = vmatmul.mubr.msk.f32.gmra.mxu1 %vm525_vm1, %v3565_v23  ;;  %775 = vmatprep.subr.mxu0 %v2779_v44  ;;  %v1208_v23 = vld [vmem:[%s4667_s4 + $0x10] sm:$0xff] }
  0x2f   : > { %809 = vmatprep.mubr.f32.mxu0 %v3371_v22  ;;  %776 = vmatpush1.msra.mxu0 %v2778_v45 }
  0x30   : > { %897 = vmatprep.subr.mxu1 %v2791_v46  ;;  %931 = vmatprep.mubr.f32.mxu1 %v3371_v22 }
  0x31   : > { %898 = vmatpush1.msra.mxu1 %v2790_v47  ;;  %2786 = vmatmul.mubr.msk.f32.vlgmr.msra.gmra.mxu0 %vm525_vm1, %v732_v48 }
  0x32   : > { %2798 = vmatmul.mubr.msk.f32.vlgmr.msra.gmra.mxu1 %vm525_vm1, %v854_v49  ;;  %815 = vmatprep.mubr.f32.mxu0 %v3371_v22 }
  0x33   : > { %937 = vmatprep.mubr.f32.mxu1 %v3371_v22  ;;  %1013 = vmatprep.subr.mxu0 %v2809_v52 }
  0x34   : > { %1014 = vmatpush1.msra.mxu0 %v2808_v53 }
  0x35   : > { %2787 = vmatmul.mubr.msk.f32.gmra.mxu0 %vm525_vm1, %v734_v54  ;;  %1015 = vmatprep.subr.mxu0 %v2807_v58 }
  0x36   : > { %2799 = vmatmul.mubr.msk.f32.gmra.mxu1 %vm525_vm1, %v856_v55  ;;  %821 = vmatprep.mubr.f32.mxu0 %v3371_v22 }
  0x37   : > { %943 = vmatprep.mubr.f32.mxu1 %v3371_v22  ;;  %1016 = vmatpush1.msra.mxu0 %v2806_v59 }
  0x38   : > { %1017 = vmatprep.subr.mxu0 %v2805_v62 }
  0x39   : > { %2788 = vmatmul.mubr.msk.f32.gmra.mxu0 %vm525_vm1, %v736_v60  ;;  %v1088_v60 = vlaneseq }
  0x3a   : > { %2800 = vmatmul.mubr.msk.f32.gmra.mxu1 %vm525_vm1, %v858_v61  ;;  %827 = vmatprep.mubr.f32.mxu0 %v3371_v22 }
  0x3b   : > { %949 = vmatprep.mubr.f32.mxu1 %v3371_v22  ;;  %1018 = vmatpush1.msra.mxu0 %v2804_v63 }
  0x3c   : > { %1019 = vmatprep.subr.mxu0 %v2803_v0 }
  0x3d   : > { %2789 = vmatmul.mubr.msk.f32.gmra.mxu0 %vm525_vm1, %v735_v56 }
  0x3e   : > { %2801 = vmatmul.mubr.msk.f32.gmra.mxu1 %vm525_vm1, %v857_v57  ;;  %1020 = vmatpush1.msra.mxu0 %v2802_v3  ;;  %v3785_v3 = vshrl.u32 %v1088_v60, 7  ;;  %v1114_v60 = vld [vmem:[%s4666_s3] sm:$0xff] }
  0x3f   : > { %1053 = vmatprep.mubr.f32.mxu0 %v3371_v22  ;;  %1193 = vmatprep.mubr.f32.mxu1 %v3371_v22 }
  0x40   : > { %1234 = vmatprep.subr.mxu0 %v3371_v22 }
  0x41   : > { %2810 = vmatmul.mubr.msk.f32.vlgmr.msra.gmra.mxu0 %vm525_vm1, %v976_v4 }
  0x42   : > { %1059 = vmatprep.mubr.f32.mxu0 %v3371_v22  ;;  %1235 = vmatpush1.msra.mxu0 %v1221_v9 }
  0x43   : > { %1236 = vmatprep.subr.mxu0 %v3371_v22 }
  0x44   : > { %1237 = vmatpush1.msra.mxu0 %v1220_v10 }
  0x45   : > { %2811 = vmatmul.mubr.msk.f32.gmra.mxu0 %vm525_vm1, %v978_v6  ;;  %1238 = vmatprep.subr.mxu0 %v3371_v22 }
  0x46   : > { %1065 = vmatprep.mubr.f32.mxu0 %v3371_v22  ;;  %1239 = vmatpush1.msra.mxu0 %v1219_v11 }
  0x47   : > { %1240 = vmatprep.subr.mxu0 %v3371_v22 }
  0x48   : > { %1241 = vmatpush1.msra.mxu0 %v1218_v12 }
  0x49   : > { %2812 = vmatmul.mubr.msk.f32.gmra.mxu0 %vm525_vm1, %v980_v8  ;;  %1242 = vmatprep.subr.mxu0 %v3371_v22 }
  0x4a   : > { %1071 = vmatprep.mubr.f32.mxu0 %v3371_v22  ;;  %1243 = vmatpush1.msra.mxu0 %v1217_v13 }
  0x4b   : > { %1244 = vmatprep.subr.mxu0 %v3371_v22 }
  0x4c   : > { %1245 = vmatpush1.msra.mxu0 %v1216_v14 }
  0x4d   : > { %2813 = vmatmul.mubr.msk.f32.gmra.mxu0 %vm525_vm1, %v979_v7  ;;  %1246 = vmatprep.subr.mxu0 %v3371_v22 }
  0x4e   : > { %1247 = vmatpush1.msra.mxu0 %v1215_v15 }
  0x4f   : > { %1248 = vmatprep.subr.mxu0 %v3371_v22 }
  0x50   : > { %1249 = vmatpush1.msra.mxu0 %v1214_v16 }
  0x51   : > { %1250 = vmatprep.subr.mxu0 %v3371_v22 }
  0x52   : > { %1251 = vmatpush1.msra.mxu0 %v1213_v17 }
  0x53   : > { %1252 = vmatprep.subr.mxu0 %v3371_v22 }
  0x54   : > { %1253 = vmatpush1.msra.mxu0 %v1212_v18  ;;  %v1090_v18 = vsub.s32 0, %v3785_v3 }
  0x55   : > { %1254 = vmatprep.subr.mxu0 %v3371_v22 }
  0x56   : > { %1255 = vmatpush1.msra.mxu0 %v1211_v19 }
  0x57   : > { %1256 = vmatprep.subr.mxu0 %v3371_v22 }
  0x58   : > { %1257 = vmatpush1.msra.mxu0 %v1210_v20 }
  0x59   : > { %1258 = vmatprep.subr.mxu0 %v3371_v22 }
  0x5a   : > { %1259 = vmatpush1.msra.mxu0 %v1209_v21 }
  0x5b   : > { %1260 = vmatprep.subr.mxu0 %v3371_v22 }
  0x5c   : > { %1261 = vmatpush1.msra.mxu0 %v1208_v23 }
  0x5d   : > { %1262 = vmatprep.subr.mxu0 %v3371_v22 }
  0x5e   : > { %1263 = vmatpush1.msra.mxu0 %v1207_v24  ;;  %v1086_v24 = vld [vmem:[%s4665_s2] sm:$0x3] }
  0x5f   : > { %1264 = vmatprep.subr.mxu0 %v3371_v22 }
  0x60   : > { %1265 = vmatpush1.msra.mxu0 %v1206_v25  ;;  %v1094_v25 = vsub.s32 1, %v3785_v3  ;;  %v1905_v3 = vld [vmem:[%s4670_s7] sm:$0x1f] }
  0x61   : > { %1288 = vmatprep.subr.mxu0 %v3371_v22 }
  0x62   : > { %1289 = vmatpush2.msra.mxu0 %v1226_v26 }
  0x63   : > { %1290 = vmatprep.subr.mxu0 %v3371_v22 }
  0x64   : > { %1291 = vmatpush2.msra.mxu0 %v1225_v27 }
  0x65   : > { %1292 = vmatprep.subr.mxu0 %v3371_v22 }
  0x66   : > { %1293 = vmatpush2.msra.mxu0 %v1224_v28 }
  0x67   : > { %1294 = vmatprep.subr.mxu0 %v3371_v22 }
  0xe1   : > { %v600_v29 = vpop.f32.mrf.mxu0 }
  0xe2   : > { %v697_v30 = vpop.f32.mrf.mxu1 }
  0xe3   : > { %v602_v31 = vpop.f32.mrf.mxu0  ;;  %v698_v15 = vadd.f32 %v697_v30, %v600_v29 }
  0xe4   : > { %v699_v32 = vpop.f32.mrf.mxu1 }
  0xe5   : > { %v606_v33 = vpop.f32.mrf.mxu0  ;;  %v700_v12 = vadd.f32 %v699_v32, %v602_v31 }
  0xe6   : > { %v703_v34 = vpop.f32.mrf.mxu1 }
  0xe7   : > { %v608_v35 = vpop.f32.mrf.mxu0  ;;  %v704_v9 = vadd.f32 %v703_v34, %v606_v33  ;;  %v1091_v34 = vrot.slane %v1086_v24, %v1090_v18 }
  0xe8   : > { %v705_v36 = vpop.f32.mrf.mxu1 }
  0xe9   : > { %v612_v37 = vpop.f32.mrf.mxu0  ;;  %v706_v5 = vadd.f32 %v705_v36, %v608_v35 }
  0xea   : > { %v709_v38 = vpop.f32.mrf.mxu1 }
  0xeb   : > { %v614_v39 = vpop.f32.mrf.mxu0  ;;  %v710_v1 = vadd.f32 %v709_v38, %v612_v37  ;;  %v1095_v38 = vrot.slane %v1086_v24, %v1094_v25 }
  0xec   : > { %v711_v40 = vpop.f32.mrf.mxu1 }
  0xed   : > { %v618_v41 = vpop.f32.mrf.mxu0  ;;  %v712_v63 = vadd.f32 %v711_v40, %v614_v39 }
  0xee   : > { %v715_v42 = vpop.f32.mrf.mxu1 }
  0xef   : > { %v620_v43 = vpop.f32.mrf.mxu0  ;;  %v716_v0 = vadd.f32 %v715_v42, %v618_v41 }
  0xf0   : > { %v717_v44 = vpop.f32.mrf.mxu1 }
  0xf1   : > { %v811_v45 = vpop.f32.mrf.mxu0  ;;  %v718_v6 = vadd.f32 %v717_v44, %v620_v43 }
  0xf2   : > { %v933_v46 = vpop.f32.mrf.mxu1  ;;  %v834_v26 = vadd.f32 %v811_v45, %v698_v15  ;;  %v2829_v15 = vld [vmem:[%s4668_s5 + $0xf8] sm:$0xff] }
  0xf3   : > { %v813_v47 = vpop.f32.mrf.mxu0 }
  0xf4   : > { %v935_v48 = vpop.f32.mrf.mxu1  ;;  %v835_v20 = vadd.f32 %v813_v47, %v700_v12  ;;  %v956_v41 = vadd.f32 %v933_v46, %v834_v26  ;;  %v2832_v12 = vld [vmem:[%s4668_s5 + $0x110] sm:$0xff] }
  0xf5   : > { %v817_v49 = vpop.f32.mrf.mxu0  ;;  %v2868_v26 = vld [vmem:[%s4668_s5 + $0x1f0] sm:$0xff] }
  0xf6   : > { %v939_v51 = vpop.f32.mrf.mxu1  ;;  %v836_v16 = vadd.f32 %v817_v49, %v704_v9  ;;  %v957_v37 = vadd.f32 %v935_v48, %v835_v20  ;;  %v2835_v9 = vld [vmem:[%s4668_s5 + $0x128] sm:$0xff] }
  0xf7   : > { %v819_v50 = vpop.f32.mrf.mxu0 }
  0xf8   : > { %v941_v53 = vpop.f32.mrf.mxu1  ;;  %v837_v13 = vadd.f32 %v819_v50, %v706_v5  ;;  %v958_v33 = vadd.f32 %v939_v51, %v836_v16  ;;  %v2839_v5 = vld [vmem:[%s4668_s5 + $0x148] sm:$0xff]  ;;  %v2828_v16 = vld [vmem:[%s4668_s5 + $0xf0] sm:$0xff] }
  0xf9   : > { %v823_v52 = vpop.f32.mrf.mxu0 }
  0xfa   : > { %v945_v56 = vpop.f32.mrf.mxu1  ;;  %v838_v10 = vadd.f32 %v823_v52, %v710_v1  ;;  %v959_v31 = vadd.f32 %v941_v53, %v837_v13  ;;  %v2841_v1 = vld [vmem:[%s4668_s5 + $0x158] sm:$0xf]  ;;  %v2831_v13 = vld [vmem:[%s4668_s5 + $0x108] sm:$0xff] }
  0xfb   : > { %v825_v54 = vpop.f32.mrf.mxu0 }
  0xfc   : > { %v947_v59 = vpop.f32.mrf.mxu1  ;;  %v839_v7 = vadd.f32 %v825_v54, %v712_v63  ;;  %v960_v27 = vadd.f32 %v945_v56, %v838_v10  ;;  %v1223_v63 = vld [vmem:[%s4667_s4 + $0x88] sm:$0xff]  ;;  %v2834_v10 = vld [vmem:[%s4668_s5 + $0x120] sm:$0xff] }
  0xfd   : > { %v829_v55 = vpop.f32.mrf.mxu0  ;;  %1295 = vmatpush2.msra.mxu0 %v1223_v63  ;;  %v1329_v63 = vld [vmem:[%s4668_s5 + $0xa0] sm:$0xf] }
  0xfe   : > { %v951_v2 = vpop.f32.mrf.mxu1  ;;  %v840_v8 = vadd.f32 %v829_v55, %v716_v0  ;;  %v961_v21 = vadd.f32 %v947_v59, %v839_v7  ;;  %1296 = vmatprep.subr.mxu0 %v3371_v22  ;;  %v1222_v0 = vld [vmem:[%s4667_s4 + $0x80] sm:$0xff]  ;;  %v2837_v7 = vld [vmem:[%s4668_s5 + $0x138] sm:$0xff] }
  0xff   : > { %v831_v57 = vpop.f32.mrf.mxu0  ;;  %1297 = vmatpush2.msra.mxu0 %v1222_v0  ;;  %v2922_v0 = vld [vmem:[%s4668_s5 + $0x360] sm:$0xf] }
 0x100   : > { %v841_v14 = vadd.f32 %v831_v57, %v718_v6  ;;  %v953_v17 = vpop.f32.mrf.mxu1  ;;  %v962_v23 = vadd.f32 %v951_v2, %v840_v8  ;;  %v2871_v2 = vld [vmem:[%s4668_s5 + $0x208] sm:$0xf]  ;;  %v2838_v6 = vld [vmem:[%s4668_s5 + $0x140] sm:$0xff]  ;;  %v2836_v8 = vld [vmem:[%s4668_s5 + $0x130] sm:$0xff] }
 0x101   : > { %v1055_v58 = vpop.f32.mrf.mxu0  ;;  %2872 = vmatprep.subr.msk.mxu0 %vm973_vm4, %v2871_v2 }
 0x102   : > { %v963_v32 = vadd.f32 %v953_v17, %v841_v14  ;;  %v1078_v49 = vadd.f32 %v1055_v58, %v956_v41  ;;  %v2830_v14 = vld [vmem:[%s4668_s5 + $0x100] sm:$0xff]  ;;  %v2827_v17 = vld [vmem:[%s4668_s5 + $0xe8] sm:$0xff]  ;;  %v2825_v41 = vld [vmem:[%s4668_s5 + $0xd8] sm:$0xff] }
 0x103   : > { %v1057_v61 = vpop.f32.mrf.mxu0 }
 0x104   : > { %v1079_v44 = vadd.f32 %v1057_v61, %v957_v37  ;;  %v1098_v48 = vadd.f32 %v1091_v34, %v1078_v49  ;;  %v2858_v37 = vld [vmem:[%s4668_s5 + $0x1a0] sm:$0xff] }
 0x105   : > { %v1061_v62 = vpop.f32.mrf.mxu0  ;;  %v2822_v49 = vld [vmem:[%s4668_s5 + $0xc0] sm:$0xff] }
 0x106   : > { %v1080_v42 = vadd.f32 %v1061_v62, %v958_v33  ;;  %v1099_v53 = vadd.f32 %v1095_v38, %v1079_v44  ;;  %v1115_v62 = vld [vmem:[%s4666_s3 + $0x8] sm:$0x3f]  ;;  %v2862_v33 = vld [vmem:[%s4668_s5 + $0x1c0] sm:$0xff] }
 0x107   : > { %v1063_v4 = vpop.f32.mrf.mxu0  ;;  %v2854_v44 = vld [vmem:[%s4668_s5 + $0x180] sm:$0xff] }
 0x108   : > { %v1081_v39 = vadd.f32 %v1063_v4, %v959_v31  ;;  %v1100_v52 = vadd.f32 %v1091_v34, %v1080_v42  ;;  %v2840_v4 = vld [vmem:[%s4668_s5 + $0x150] sm:$0xf]  ;;  %v2866_v31 = vld [vmem:[%s4668_s5 + $0x1e0] sm:$0xff]  ;;  %v2855_v42 = vld [vmem:[%s4668_s5 + $0x188] sm:$0xff] }
 0x109   : > { %v1067_v11 = vpop.f32.mrf.mxu0 }
 0x10a   : > { %v1082_v35 = vadd.f32 %v1067_v11, %v960_v27  ;;  %v1101_v51 = vadd.f32 %v1095_v38, %v1081_v39  ;;  %v2833_v11 = vld [vmem:[%s4668_s5 + $0x118] sm:$0xff]  ;;  %v2867_v27 = vld [vmem:[%s4668_s5 + $0x1e8] sm:$0xff]  ;;  %v2826_v39 = vld [vmem:[%s4668_s5 + $0xe0] sm:$0xff] }
 0x10b   : > { %v1069_v19 = vpop.f32.mrf.mxu0 }
 0x10c   : > { %v1083_v29 = vadd.f32 %v1069_v19, %v961_v21  ;;  %v1102_v50 = vadd.f32 %v1091_v34, %v1082_v35  ;;  %v2870_v21 = vld [vmem:[%s4668_s5 + $0x200] sm:$0xf]  ;;  %v2860_v35 = vld [vmem:[%s4668_s5 + $0x1b0] sm:$0xff] }
 0x10d   : > { %v1073_v28 = vpop.f32.mrf.mxu0 }
 0x10e   : > { %v1084_v30 = vadd.f32 %v1073_v28, %v962_v23  ;;  %v1103_v45 = vadd.f32 %v1095_v38, %v1083_v29  ;;  %v2869_v23 = vld [vmem:[%s4668_s5 + $0x1f8] sm:$0xff]  ;;  %v2864_v29 = vld [vmem:[%s4668_s5 + $0x1d0] sm:$0xff] }
 0x10f   : > { %v1075_v36 = vpop.f32.mrf.mxu0 }
 0x110   : > { %v1085_v40 = vadd.f32 %v1075_v36, %v963_v32  ;;  %v1104_v43 = vadd.f32 %v1091_v34, %v1084_v30  ;;  %v2865_v32 = vld [vmem:[%s4668_s5 + $0x1d8] sm:$0xff]  ;;  %v2863_v30 = vld [vmem:[%s4668_s5 + $0x1c8] sm:$0xff] }
 0x111   : > { %v2861_v34 = vld [vmem:[%s4668_s5 + $0x1b8] sm:$0xff]  ;;  %v2859_v36 = vld [vmem:[%s4668_s5 + $0x1a8] sm:$0xff] }
 0x112   : > { %v1105_v47 = vadd.f32 %v1095_v38, %v1085_v40  ;;  %v2857_v38 = vld [vmem:[%s4668_s5 + $0x198] sm:$0xff]  ;;  %v2856_v40 = vld [vmem:[%s4668_s5 + $0x190] sm:$0xff] }
 0x114   : > { %3281 = vtanh.f32 %v1105_v47  ;;  %v2853_v47 = vld [vmem:[%s4668_s5 + $0x178] sm:$0xff] }
 0x115   : > { %3283 = vtanh.f32 %v1104_v43  ;;  %v2824_v43 = vld [vmem:[%s4668_s5 + $0xd0] sm:$0xff] }
 0x116   : > { %3285 = vtanh.f32 %v1103_v45  ;;  %v2823_v45 = vld [vmem:[%s4668_s5 + $0xc8] sm:$0xff] }
 0x117   : > { %3287 = vtanh.f32 %v1102_v50  ;;  %v2852_v50 = vld [vmem:[%s4668_s5 + $0x170] sm:$0xff] }
 0x118   : > { %3289 = vtanh.f32 %v1101_v51  ;;  %v2821_v51 = vld [vmem:[%s4668_s5 + $0xb8] sm:$0xff] }
 0x119   : > { %3291 = vtanh.f32 %v1100_v52  ;;  %v2851_v52 = vld [vmem:[%s4668_s5 + $0x168] sm:$0xff] }
 0x11a   : > { %3293 = vtanh.f32 %v1099_v53  ;;  %v2820_v53 = vld [vmem:[%s4668_s5 + $0xb0] sm:$0xff] }
 0x11b   : > { %3295 = vtanh.f32 %v1098_v48  ;;  %v2850_v48 = vld [vmem:[%s4668_s5 + $0x160] sm:$0xff] }
 0x121   : > { %v3282_v46 = vpop.eup %3281 }
 0x122   : > { %v3284_v54 = vpop.eup %3283  ;;  %2814 = vmatprep.subr.msk.mxu1 %vm973_vm4, %v3282_v46  ;;  %v1330_v46 = vld [vmem:[%s4668_s5 + $0xa8] sm:$0xf] }
 0x123   : > { %v3286_v55 = vpop.eup %3285  ;;  %2815 = vmatpush1.msk.msra.mxu1 %vm973_vm4, %v3284_v54  ;;  %v2923_v54 = vld [vmem:[%s4668_s5 + $0x368] sm:$0xf] }
 0x124   : > { %v3288_v56 = vpop.eup %3287  ;;  %1155 = vmatprep.subr.mxu1 %v3286_v55 }
 0x125   : > { %v3290_v57 = vpop.eup %3289  ;;  %1156 = vmatpush1.msra.mxu1 %v3288_v56 }
 0x126   : > { %v3292_v58 = vpop.eup %3291  ;;  %1157 = vmatprep.subr.mxu1 %v3290_v57 }
 0x127   : > { %v3294_v59 = vpop.eup %3293  ;;  %1158 = vmatpush1.msra.mxu1 %v3292_v58 }
 0x128   : > { %v3296_v61 = vpop.eup %3295  ;;  %1159 = vmatprep.subr.mxu1 %v3294_v59 }
 0x129   : > { %1160 = vmatpush1.msra.mxu1 %v3296_v61 }
 0x12a   : > { %2816 = vmatmul.mubr.msk.f32.vlgmr.msra.gmra.mxu1 %vm1116_vm5, %v1114_v60  ;;  %2842 = vmatprep.subr.msk.mxu1 %vm973_vm4, %v2841_v1 }
 0x12b   : > { %1199 = vmatprep.mubr.f32.mxu1 %v3371_v22  ;;  %2843 = vmatpush1.msk.msra.mxu1 %vm973_vm4, %v2840_v4  ;;  %v1328_v4 = vld [vmem:[%s4668_s5 + $0x98] sm:$0xff] }
 0x12c   : > { %1382 = vmatprep.subr.mxu1 %v2839_v5  ;;  %v2921_v5 = vld [vmem:[%s4668_s5 + $0x358] sm:$0xff] }
 0x12d   : > { %1383 = vmatpush1.msra.mxu1 %v2838_v6  ;;  %v1327_v6 = vld [vmem:[%s4668_s5 + $0x90] sm:$0xff] }
 0x12e   : > { %2817 = vmatmul.mubr.msk.f32.gmra.mxu1 %vm1116_vm5, %v1115_v62  ;;  %1384 = vmatprep.subr.mxu1 %v2837_v7  ;;  %v2920_v7 = vld [vmem:[%s4668_s5 + $0x350] sm:$0xff] }
 0x12f   : > { %1434 = vmatprep.mubr.f32.mxu1 %v3371_v22  ;;  %1385 = vmatpush1.msra.mxu1 %v2836_v8  ;;  %v1326_v8 = vld [vmem:[%s4668_s5 + $0x88] sm:$0xff] }
 0x130   : > { %1386 = vmatprep.subr.mxu1 %v2835_v9  ;;  %v2919_v9 = vld [vmem:[%s4668_s5 + $0x348] sm:$0xff] }
 0x131   : > { %1387 = vmatpush1.msra.mxu1 %v2834_v10  ;;  %v1325_v10 = vld [vmem:[%s4668_s5 + $0x80] sm:$0xff] }
 0x132   : > { %1388 = vmatprep.subr.mxu1 %v2833_v11  ;;  %v2918_v11 = vld [vmem:[%s4668_s5 + $0x340] sm:$0xff] }
 0x133   : > { %1389 = vmatpush1.msra.mxu1 %v2832_v12  ;;  %v1324_v12 = vld [vmem:[%s4668_s5 + $0x78] sm:$0xff] }
 0x134   : > { %1390 = vmatprep.subr.mxu1 %v2831_v13  ;;  %v2917_v13 = vld [vmem:[%s4668_s5 + $0x338] sm:$0xff] }
 0x135   : > { %1391 = vmatpush1.msra.mxu1 %v2830_v14  ;;  %v1323_v14 = vld [vmem:[%s4668_s5 + $0x70] sm:$0xff] }
 0x136   : > { %1392 = vmatprep.subr.mxu1 %v2829_v15  ;;  %v2916_v15 = vld [vmem:[%s4668_s5 + $0x330] sm:$0xff] }
 0x137   : > { %1393 = vmatpush1.msra.mxu1 %v2828_v16  ;;  %v1322_v16 = vld [vmem:[%s4668_s5 + $0x68] sm:$0xff] }
 0x138   : > { %1394 = vmatprep.subr.mxu1 %v2827_v17  ;;  %v2915_v17 = vld [vmem:[%s4668_s5 + $0x328] sm:$0xff] }
 0x139   : > { %1395 = vmatpush1.msra.mxu1 %v2826_v39  ;;  %v1312_v39 = vld [vmem:[%s4668_s5 + $0x18] sm:$0xff] }
 0x13a   : > { %1396 = vmatprep.subr.mxu1 %v2825_v41  ;;  %v1311_v41 = vld [vmem:[%s4668_s5 + $0x10] sm:$0xff] }
 0x13b   : > { %1397 = vmatpush1.msra.mxu1 %v2824_v43  ;;  %v1310_v43 = vld [vmem:[%s4668_s5 + $0x8] sm:$0xff] }
 0x13c   : > { %1398 = vmatprep.subr.mxu1 %v2823_v45  ;;  %v1309_v45 = vld [vmem:[%s4668_s5] sm:$0xff] }
 0x13d   : > { %1399 = vmatpush1.msra.mxu1 %v2822_v49  ;;  %v2902_v49 = vld [vmem:[%s4668_s5 + $0x2c0] sm:$0xff] }
 0x13e   : > { %1400 = vmatprep.subr.mxu1 %v2821_v51 }
 0x13f   : > { %1401 = vmatpush1.msra.mxu1 %v2820_v53  ;;  %v2895_v53 = vld [vmem:[%s4668_s5 + $0x2a8] sm:$0xff] }
 0x140   : > { %2846 = vmatprep.subr.msk.mxu1 %vm973_vm4, %v1330_v46  ;;  %v2894_v46 = vld [vmem:[%s4668_s5 + $0x2a0] sm:$0xff] }
 0x1ea   : > { %v1195_v19 = vpop.f32.mrf.mxu1 }
 0x1ec   : > { %v1197_v20 = vpop.f32.mrf.mxu1 }
 0x1ed   : > { %2818 = vmatprep.mubr.msk.f32.mxu0 %vm1227_vm6, %v1197_v20  ;;  %v2914_v20 = vld [vmem:[%s4668_s5 + $0x320] sm:$0xff] }
 0x1ee   : > { %v1201_v24 = vpop.f32.mrf.mxu1  ;;  %1299 = vmatmul.mubr.f32.vlgmr.msra.gmra.mxu0 %v1195_v19  ;;  %v1321_v19 = vld [vmem:[%s4668_s5 + $0x60] sm:$0xff] }
 0x1ef   : > { %2873 = vmatpush1.msk.msra.mxu0 %vm973_vm4, %v2870_v21  ;;  %v1320_v21 = vld [vmem:[%s4668_s5 + $0x58] sm:$0xff] }
 0x1f0   : > { %v1203_v28 = vpop.f32.mrf.mxu1  ;;  %1582 = vmatprep.subr.mxu0 %v2869_v23  ;;  %v2913_v23 = vld [vmem:[%s4668_s5 + $0x318] sm:$0xff] }
 0x1f1   : > { %2819 = vmatprep.mubr.msk.f32.mxu0 %vm1227_vm6, %v1203_v28  ;;  %1583 = vmatpush1.msra.mxu0 %v2868_v26  ;;  %v2912_v26 = vld [vmem:[%s4668_s5 + $0x310] sm:$0xff]  ;;  %v2911_v28 = vld [vmem:[%s4668_s5 + $0x308] sm:$0xff] }
 0x1f2   : > { %1304 = vmatmul.mubr.f32.gmra.mxu0 %v1201_v24  ;;  %1584 = vmatprep.subr.mxu0 %v2867_v27  ;;  %v1319_v24 = vld [vmem:[%s4668_s5 + $0x50] sm:$0xff]  ;;  %v1318_v27 = vld [vmem:[%s4668_s5 + $0x48] sm:$0xff] }
 0x1f3   : > { %1585 = vmatpush1.msra.mxu0 %v2866_v31  ;;  %1634 = vmatprep.mubr.f32.mxu0 %v3371_v22  ;;  %v1317_v31 = vld [vmem:[%s4668_s5 + $0x40] sm:$0xff] }
 0x1f4   : > { %1586 = vmatprep.subr.mxu0 %v2865_v32  ;;  %v2910_v32 = vld [vmem:[%s4668_s5 + $0x300] sm:$0xff] }
 0x1f5   : > { %1587 = vmatpush1.msra.mxu0 %v2864_v29  ;;  %v1316_v29 = vld [vmem:[%s4668_s5 + $0x38] sm:$0xff] }
 0x1f6   : > { %1588 = vmatprep.subr.mxu0 %v2863_v30  ;;  %v2909_v30 = vld [vmem:[%s4668_s5 + $0x2f8] sm:$0xff] }
 0x1f7   : > { %1589 = vmatpush1.msra.mxu0 %v2862_v33  ;;  %v1315_v33 = vld [vmem:[%s4668_s5 + $0x30] sm:$0xff] }
 0x1f8   : > { %1590 = vmatprep.subr.mxu0 %v2861_v34  ;;  %v2908_v34 = vld [vmem:[%s4668_s5 + $0x2f0] sm:$0xff] }
 0x1f9   : > { %1591 = vmatpush1.msra.mxu0 %v2860_v35  ;;  %v1314_v35 = vld [vmem:[%s4668_s5 + $0x28] sm:$0xff] }
 0x1fa   : > { %1592 = vmatprep.subr.mxu0 %v2859_v36  ;;  %v2907_v36 = vld [vmem:[%s4668_s5 + $0x2e8] sm:$0xff] }
 0x1fb   : > { %1593 = vmatpush1.msra.mxu0 %v2858_v37  ;;  %v1313_v37 = vld [vmem:[%s4668_s5 + $0x20] sm:$0xff] }
 0x1fc   : > { %1594 = vmatprep.subr.mxu0 %v2857_v38  ;;  %v2906_v38 = vld [vmem:[%s4668_s5 + $0x2e0] sm:$0xff] }
 0x1fd   : > { %1595 = vmatpush1.msra.mxu0 %v2856_v40  ;;  %v2905_v40 = vld [vmem:[%s4668_s5 + $0x2d8] sm:$0xff] }
 0x1fe   : > { %1596 = vmatprep.subr.mxu0 %v2855_v42  ;;  %v2904_v42 = vld [vmem:[%s4668_s5 + $0x2d0] sm:$0xff] }
 0x1ff   : > { %1597 = vmatpush1.msra.mxu0 %v2854_v44  ;;  %v2903_v44 = vld [vmem:[%s4668_s5 + $0x2c8] sm:$0xff] }
 0x200   : > { %1598 = vmatprep.subr.mxu0 %v2853_v47 }
 0x201   : > { %1599 = vmatpush1.msra.mxu0 %v2852_v50  ;;  %v2897_v50 = vld [vmem:[%s4668_s5 + $0x2b8] sm:$0xf] }
 0x202   : > { %1600 = vmatprep.subr.mxu0 %v2851_v52  ;;  %v2896_v52 = vld [vmem:[%s4668_s5 + $0x2b0] sm:$0xf] }
 0x203   : > { %1601 = vmatpush1.msra.mxu0 %v2850_v48 }
 0x204   : > { %2924 = vmatprep.subr.msk.mxu0 %vm973_vm4, %v2923_v54  ;;  %v2893_v54 = vld [vmem:[%s4668_s5 + $0x298] sm:$0xff] }
 0x2ae   : > { %v3958_v55 = vpop.f32.mrf.mxu0 }
 0x2af   : > { %v1356_v58 = vrot.slane %v3958_v55, 1  ;;  %v1557_v59 = vrot.slane %v3958_v55, 2  ;;  %v1791_v51 = vrot.slane %v3958_v55, 4 }
 0x2b0   : > { %v1302_v56 = vpop.f32.mrf.mxu0 }
 0x2b1   : > { %v2892_v56 = vld [vmem:[%s4668_s5 + $0x290] sm:$0xff] }
 0x2b2   : > { %v3960_v57 = vpop.f32.mrf.mxu0 }
 0x2b3   : > { %v1357_v60 = vrot.slane %v3960_v57, 1  ;;  %v1558_v61 = vrot.slane %v3960_v57, 2  ;;  %v1792_v47 = vrot.slane %v3960_v57, 4 }
 0x2b4   : > { %v1307_v62 = vpop.f32.mrf.mxu0 }
 0x2b5   : > { %v1358_v1 = vsel %vm517_vm0, %v1356_v58, %v1357_v60  ;;  %v1559_v2 = vsel %vm729_vm2, %v1557_v59, %v1558_v61  ;;  %v1793_v48 = vsel %vm973_vm4, %v1791_v51, %v1792_v47  ;;  %v2891_v58 = vld [vmem:[%s4668_s5 + $0x288] sm:$0xff]  ;;  %v2890_v59 = vld [vmem:[%s4668_s5 + $0x280] sm:$0xff] }
 0x2b6   : > { %2844 = vmatmul.mubr.msk.f32.vlgmr.msra.gmra.mxu1 %vm1359_vm7, %v1358_v1  ;;  %2874 = vmatmul.mubr.msk.f32.vlgmr.msra.gmra.mxu0 %vm1359_vm7, %v1559_v2  ;;  %v2887_v62 = vld [vmem:[%s4668_s5 + $0x268] sm:$0xff]  ;;  %v2884_v1 = vld [vmem:[%s4668_s5 + $0x250] sm:$0xff] }
 0x2b7   : > { %2847 = vmatpush1.msk.msra.mxu1 %vm973_vm4, %v1329_v63  ;;  %2925 = vmatpush1.msk.msra.mxu0 %vm973_vm4, %v2922_v0  ;;  %v2886_v63 = vld [vmem:[%s4668_s5 + $0x260] sm:$0xff]  ;;  %v2885_v0 = vld [vmem:[%s4668_s5 + $0x258] sm:$0xff]  ;;  %v2883_v2 = vld [vmem:[%s4668_s5 + $0x248] sm:$0xff] }
 0x2b8   : > { %1469 = vmatprep.subr.mxu1 %v1328_v4  ;;  %1816 = vmatprep.subr.mxu0 %v2921_v5  ;;  %v2882_v4 = vld [vmem:[%s4668_s5 + $0x240] sm:$0xff]  ;;  %v2881_v5 = vld [vmem:[%s4668_s5 + $0x238] sm:$0xff] }
 0x2b9   : > { %1470 = vmatpush1.msra.mxu1 %v1327_v6  ;;  %1817 = vmatpush1.msra.mxu0 %v2920_v7  ;;  %v2880_v6 = vld [vmem:[%s4668_s5 + $0x230] sm:$0xff]  ;;  %v2879_v7 = vld [vmem:[%s4668_s5 + $0x228] sm:$0xff] }
 0x2ba   : > { %1440 = vmatprep.mubr.f32.mxu1 %v3371_v22  ;;  %1471 = vmatprep.subr.mxu1 %v1326_v8  ;;  %v2878_v8 = vld [vmem:[%s4668_s5 + $0x220] sm:$0xff] }
 0x2bb   : > { %1640 = vmatprep.mubr.f32.mxu0 %v3371_v22  ;;  %1818 = vmatprep.subr.mxu0 %v2919_v9  ;;  %v1675_v9 = vrot.slane %v3960_v57, 3 }
 0x2bc   : > { %2845 = vmatmul.mubr.msk.f32.gmra.mxu1 %vm1359_vm7, %v1357_v60  ;;  %2875 = vmatmul.mubr.msk.f32.gmra.mxu0 %vm1359_vm7, %v1558_v61  ;;  %v2889_v60 = vld [vmem:[%s4668_s5 + $0x278] sm:$0xff]  ;;  %v2888_v61 = vld [vmem:[%s4668_s5 + $0x270] sm:$0xff] }
 0x2bd   : > { %1472 = vmatpush1.msra.mxu1 %v1325_v10  ;;  %1819 = vmatpush1.msra.mxu0 %v2918_v11  ;;  %v2877_v10 = vld [vmem:[%s4668_s5 + $0x218] sm:$0xff]  ;;  %v2876_v11 = vld [vmem:[%s4668_s5 + $0x210] sm:$0xff] }
 0x2be   : > { %1473 = vmatprep.subr.mxu1 %v1324_v12  ;;  %1820 = vmatprep.subr.mxu0 %v2917_v13  ;;  %v1674_v12 = vrot.slane %v3958_v55, 3 }
 0x2bf   : > { %1474 = vmatpush1.msra.mxu1 %v1323_v14  ;;  %1821 = vmatpush1.msra.mxu0 %v2916_v15 }
 0x2c0   : > { %1475 = vmatprep.subr.mxu1 %v1322_v16  ;;  %1822 = vmatprep.subr.mxu0 %v2915_v17  ;;  %v1676_v13 = vsel %vm851_vm3, %v1674_v12, %v1675_v9  ;;  %v1990_v12 = vld [vmem:[%s4671_s8 + $0x10] sm:$0xff] }
 0x2c1   : > { %1476 = vmatpush1.msra.mxu1 %v1321_v19  ;;  %1823 = vmatpush1.msra.mxu0 %v2914_v20 }
 0x2c2   : > { %1477 = vmatprep.subr.mxu1 %v1320_v21  ;;  %1824 = vmatprep.subr.mxu0 %v2913_v23 }
 0x2c3   : > { %1478 = vmatpush1.msra.mxu1 %v1319_v24  ;;  %1825 = vmatpush1.msra.mxu0 %v2912_v26 }
 0x2c4   : > { %1479 = vmatprep.subr.mxu1 %v1318_v27  ;;  %1826 = vmatprep.subr.mxu0 %v2911_v28 }
 0x2c5   : > { %1480 = vmatpush1.msra.mxu1 %v1317_v31  ;;  %1827 = vmatpush1.msra.mxu0 %v2910_v32 }
 0x2c6   : > { %1481 = vmatprep.subr.mxu1 %v1316_v29  ;;  %1828 = vmatprep.subr.mxu0 %v2909_v30 }
 0x2c7   : > { %1482 = vmatpush1.msra.mxu1 %v1315_v33  ;;  %1829 = vmatpush1.msra.mxu0 %v2908_v34 }
 0x2c8   : > { %1483 = vmatprep.subr.mxu1 %v1314_v35  ;;  %1830 = vmatprep.subr.mxu0 %v2907_v36 }
 0x2c9   : > { %1484 = vmatpush1.msra.mxu1 %v1313_v37  ;;  %1831 = vmatpush1.msra.mxu0 %v2906_v38 }
 0x2ca   : > { %1485 = vmatprep.subr.mxu1 %v1312_v39  ;;  %1832 = vmatprep.subr.mxu0 %v2905_v40 }
 0x2cb   : > { %1486 = vmatpush1.msra.mxu1 %v1311_v41  ;;  %1833 = vmatpush1.msra.mxu0 %v2904_v42  ;;  %v1885_v42 = vld [vmem:[%s4669_s6] sm:$0x3] }
 0x2cc   : > { %1487 = vmatprep.subr.mxu1 %v1310_v43  ;;  %1834 = vmatprep.subr.mxu0 %v2903_v44 }
 0x2cd   : > { %1488 = vmatpush1.msra.mxu1 %v1309_v45  ;;  %1521 = vmatprep.mubr.f32.mxu1 %v3371_v22 }
 0x2ce   : > { %1835 = vmatpush1.msra.mxu0 %v2902_v49  ;;  %1868 = vmatprep.mubr.f32.mxu0 %v3371_v22  ;;  %v1894_v49 = vrot.slane %v1885_v42, %v1094_v25 }
 0x2cf   : > { %2848 = vmatmul.mubr.msk.f32.vlgmr.msra.gmra.mxu1 %vm1359_vm7, %v3958_v55  ;;  %2898 = vmatprep.subr.msk.mxu1 %vm973_vm4, %v2897_v50 }
 0x2d0   : > { %2926 = vmatmul.mubr.msk.f32.vlgmr.msra.gmra.mxu0 %vm1359_vm7, %v1793_v48  ;;  %2899 = vmatpush1.msk.msra.mxu1 %vm973_vm4, %v2896_v52  ;;  %v1890_v48 = vrot.slane %v1885_v42, %v1090_v18 }
 0x2d1   : > { %1699 = vmatprep.subr.mxu1 %v2895_v53  ;;  %1527 = vmatprep.mubr.f32.mxu1 %v3371_v22 }
 0x2d2   : > { %1700 = vmatpush1.msra.mxu1 %v2894_v46  ;;  %1874 = vmatprep.mubr.f32.mxu0 %v3371_v22 }
 0x2d3   : > { %2849 = vmatmul.mubr.msk.f32.gmra.mxu1 %vm1359_vm7, %v3960_v57  ;;  %1701 = vmatprep.subr.mxu1 %v2893_v54 }
 0x2d4   : > { %2927 = vmatmul.mubr.msk.f32.gmra.mxu0 %vm1359_vm7, %v1792_v47  ;;  %1702 = vmatpush1.msra.mxu1 %v2892_v56 }
 0x2d5   : > { %1703 = vmatprep.subr.mxu1 %v2891_v58  ;;  %1751 = vmatprep.mubr.f32.mxu1 %v3371_v22 }
 0x2d6   : > { %1704 = vmatpush1.msra.mxu1 %v2890_v59  ;;  %3067 = vmatprep.subr.mxu0 %v3371_v22 }
 0x2d7   : > { %1705 = vmatprep.subr.mxu1 %v2889_v60  ;;  %3087 = vmatprep.mubr.msk.f32.mxu0 %vm3372_vm10, %v3371_v22 }
 0x2d8   : > { %1706 = vmatpush1.msra.mxu1 %v2888_v61 }
 0x2d9   : > { %1707 = vmatprep.subr.mxu1 %v2887_v62  ;;  %v2003_v62 = vld [vmem:[%s4671_s8 + $0x78] sm:$0xff] }
 0x2da   : > { %1708 = vmatpush1.msra.mxu1 %v2886_v63  ;;  %v2002_v63 = vld [vmem:[%s4671_s8 + $0x70] sm:$0xff] }
 0x2db   : > { %1709 = vmatprep.subr.mxu1 %v2885_v0  ;;  %v2001_v0 = vld [vmem:[%s4671_s8 + $0x68] sm:$0xff] }
 0x2dc   : > { %1710 = vmatpush1.msra.mxu1 %v2884_v1  ;;  %v2000_v1 = vld [vmem:[%s4671_s8 + $0x60] sm:$0xff] }
 0x2dd   : > { %1711 = vmatprep.subr.mxu1 %v2883_v2  ;;  %v1999_v2 = vld [vmem:[%s4671_s8 + $0x58] sm:$0xff] }
 0x2de   : > { %1712 = vmatpush1.msra.mxu1 %v2882_v4  ;;  %v1998_v4 = vld [vmem:[%s4671_s8 + $0x50] sm:$0xff] }
 0x2df   : > { %1713 = vmatprep.subr.mxu1 %v2881_v5  ;;  %v1997_v5 = vld [vmem:[%s4671_s8 + $0x48] sm:$0xff] }
 0x2e0   : > { %1714 = vmatpush1.msra.mxu1 %v2880_v6  ;;  %v1996_v6 = vld [vmem:[%s4671_s8 + $0x40] sm:$0xff] }
 0x2e1   : > { %1715 = vmatprep.subr.mxu1 %v2879_v7  ;;  %v1995_v7 = vld [vmem:[%s4671_s8 + $0x38] sm:$0xff] }
 0x2e2   : > { %1716 = vmatpush1.msra.mxu1 %v2878_v8  ;;  %v1994_v8 = vld [vmem:[%s4671_s8 + $0x30] sm:$0xff] }
 0x2e3   : > { %1717 = vmatprep.subr.mxu1 %v2877_v10  ;;  %v1992_v10 = vld [vmem:[%s4671_s8 + $0x20] sm:$0xff] }
 0x2e4   : > { %1718 = vmatpush1.msra.mxu1 %v2876_v11  ;;  %v1991_v11 = vld [vmem:[%s4671_s8 + $0x18] sm:$0xff] }
 0x2e5   : > { %2900 = vmatmul.mubr.msk.f32.vlgmr.msra.gmra.mxu1 %vm1359_vm7, %v1676_v13  ;;  %v1989_v13 = vld [vmem:[%s4671_s8 + $0x8] sm:$0xff] }
 0x2e6   : > { %1757 = vmatprep.mubr.f32.mxu1 %v3371_v22 }
 0x2e9   : > { %2901 = vmatmul.mubr.msk.f32.gmra.mxu1 %vm1359_vm7, %v1675_v9  ;;  %v1993_v9 = vld [vmem:[%s4671_s8 + $0x28] sm:$0xff] }
 0x2ea   : > { %1981 = vmatprep.mubr.f32.mxu1 %v3371_v22 }
 0x376   : > { %v1436_v57 = vpop.f32.mrf.mxu1  ;;  %v1636_v16 = vpop.f32.mrf.mxu0 }
 0x378   : > { %v1438_v14 = vpop.f32.mrf.mxu1  ;;  %v1638_v19 = vpop.f32.mrf.mxu0 }
 0x37c   : > { %v1442_v15 = vpop.f32.mrf.mxu1  ;;  %v1642_v20 = vpop.f32.mrf.mxu0 }
 0x37e   : > { %v1444_v17 = vpop.f32.mrf.mxu1  ;;  %v1644_v23 = vpop.f32.mrf.mxu0 }
 0x38f   : > { %v1523_v55 = vpop.f32.mrf.mxu1 }
 0x390   : > { %v1870_v26 = vpop.f32.mrf.mxu0  ;;  %v1524_v28 = vadd.f32 %v1523_v55, %v1436_v57  ;;  %v1988_v57 = vld [vmem:[%s4671_s8] sm:$0xff]  ;;  %v2940_v55 = vld [vmem:[%s4672_s9 + $0x90] sm:$0xff] }
 0x391   : > { %v1525_v21 = vpop.f32.mrf.mxu1 }
 0x392   : > { %v1526_v27 = vadd.f32 %v1525_v21, %v1438_v14  ;;  %v1872_v29 = vpop.f32.mrf.mxu0  ;;  %v1647_v35 = vadd.f32 %v1636_v16, %v1524_v28  ;;  %v2007_v14 = vld [vmem:[%s4671_s8 + $0x98] sm:$0xff]  ;;  %v2005_v16 = vld [vmem:[%s4671_s8 + $0x88] sm:$0xff]  ;;  %v2938_v21 = vld [vmem:[%s4672_s9 + $0x80] sm:$0xff] }
 0x393   : > { %v1529_v24 = vpop.f32.mrf.mxu1  ;;  %v2933_v28 = vld [vmem:[%s4672_s9 + $0x58] sm:$0xff] }
 0x394   : > { %v1530_v32 = vadd.f32 %v1529_v24, %v1442_v15  ;;  %v1648_v34 = vadd.f32 %v1638_v19, %v1526_v27  ;;  %v1876_v39 = vpop.f32.mrf.mxu0  ;;  %v2006_v15 = vld [vmem:[%s4671_s8 + $0x90] sm:$0xff]  ;;  %v2941_v19 = vld [vmem:[%s4672_s9 + $0x98] sm:$0xff]  ;;  %v2934_v27 = vld [vmem:[%s4672_s9 + $0x60] sm:$0xff] }
 0x395   : > { %v1531_v31 = vpop.f32.mrf.mxu1  ;;  %3068 = vmatpush3.msra.mxu0 %v2941_v19  ;;  %v2936_v24 = vld [vmem:[%s4672_s9 + $0x70] sm:$0xff]  ;;  %v2516_v19 = vld [vmem:[%s4674_s11 + $0x48] sm:$0xff] }
 0x396   : > { %v1532_v33 = vadd.f32 %v1531_v31, %v1444_v17  ;;  %v1649_v38 = vadd.f32 %v1642_v20, %v1530_v32  ;;  %v1878_v52 = vpop.f32.mrf.mxu0  ;;  %v2004_v17 = vld [vmem:[%s4671_s8 + $0x80] sm:$0xff]  ;;  %3069 = vmatprep.subr.mxu0 %v3371_v22  ;;  %v2939_v20 = vld [vmem:[%s4672_s9 + $0x88] sm:$0xff] }
 0x397   : > { %3070 = vmatpush3.msra.mxu0 %v2940_v55  ;;  %v2515_v55 = vld [vmem:[%s4674_s11 + $0x40] sm:$0xff] }
 0x398   : > { %v1650_v44 = vadd.f32 %v1644_v23, %v1532_v33  ;;  %3071 = vmatprep.subr.mxu0 %v3371_v22  ;;  %v2937_v23 = vld [vmem:[%s4672_s9 + $0x78] sm:$0xff] }
 0x399   : > { %3072 = vmatpush3.msra.mxu0 %v2939_v20  ;;  %v2951_v33 = vld [vmem:[%s4672_s9 + $0xd8] sm:$0xff] }
 0x39a   : > { %3073 = vmatprep.subr.mxu0 %v3371_v22  ;;  %v2514_v20 = vld [vmem:[%s4674_s11 + $0x38] sm:$0xff] }
 0x39b   : > { %3074 = vmatpush3.msra.mxu0 %v2938_v21  ;;  %v2513_v21 = vld [vmem:[%s4674_s11 + $0x30] sm:$0xff] }
 0x39c   : > { %3075 = vmatprep.subr.mxu0 %v3371_v22 }
 0x39d   : > { %3076 = vmatpush3.msra.mxu0 %v2937_v23  ;;  %v2512_v23 = vld [vmem:[%s4674_s11 + $0x28] sm:$0xff] }
 0x39e   : > { %3077 = vmatprep.subr.mxu0 %v3371_v22 }
 0x39f   : > { %3078 = vmatpush3.msra.mxu0 %v2936_v24  ;;  %v2511_v24 = vld [vmem:[%s4674_s11 + $0x20] sm:$0xff] }
 0x3a0   : > { %3079 = vmatprep.subr.mxu0 %v3371_v22 }
 0x3a5   : > { %v1753_v30 = vpop.f32.mrf.mxu1 }
 0x3a6   : > { %v1764_v40 = vadd.f32 %v1753_v30, %v1647_v35  ;;  %v2952_v30 = vld [vmem:[%s4672_s9 + $0xe0] sm:$0xff]  ;;  %v2949_v35 = vld [vmem:[%s4672_s9 + $0xc8] sm:$0xff] }
 0x3a7   : > { %v1755_v36 = vpop.f32.mrf.mxu1 }
 0x3a8   : > { %v1765_v37 = vadd.f32 %v1755_v36, %v1648_v34  ;;  %v1881_v53 = vadd.f32 %v1870_v26, %v1764_v40  ;;  %v2935_v26 = vld [vmem:[%s4672_s9 + $0x68] sm:$0xff]  ;;  %v2950_v34 = vld [vmem:[%s4672_s9 + $0xd0] sm:$0xff]  ;;  %v2948_v36 = vld [vmem:[%s4672_s9 + $0xc0] sm:$0xff] }
 0x3a9   : > { %v1759_v41 = vpop.f32.mrf.mxu1  ;;  %3080 = vmatpush3.msra.mxu0 %v2935_v26  ;;  %v2932_v40 = vld [vmem:[%s4672_s9 + $0x50] sm:$0xff]  ;;  %v2510_v26 = vld [vmem:[%s4674_s11 + $0x18] sm:$0xff] }
 0x3aa   : > { %v1766_v43 = vadd.f32 %v1759_v41, %v1649_v38  ;;  %v1882_v47 = vadd.f32 %v1872_v29, %v1765_v37  ;;  %v1897_v59 = vadd.f32 %v1890_v48, %v1881_v53  ;;  %3081 = vmatprep.subr.mxu0 %v3371_v22  ;;  %v2953_v29 = vld [vmem:[%s4672_s9 + $0xe8] sm:$0xff]  ;;  %v2947_v37 = vld [vmem:[%s4672_s9 + $0xb8] sm:$0xff]  ;;  %v2946_v38 = vld [vmem:[%s4672_s9 + $0xb0] sm:$0xff] }
 0x3ab   : > { %v1761_v45 = vpop.f32.mrf.mxu1  ;;  %3082 = vmatpush3.msra.mxu0 %v2934_v27  ;;  %v2944_v41 = vld [vmem:[%s4672_s9 + $0xa0] sm:$0xff]  ;;  %v2973_v53 = vld [vmem:[%s4672_s9 + $0x178] sm:$0xff]  ;;  %v2509_v27 = vld [vmem:[%s4674_s11 + $0x10] sm:$0xff] }
 0x3ac   : > { %v1883_v50 = vadd.f32 %v1876_v39, %v1766_v43  ;;  %v1767_v51 = vadd.f32 %v1761_v45, %v1650_v44  ;;  %v1898_v56 = vadd.f32 %v1894_v49, %v1882_v47  ;;  %3083 = vmatprep.subr.mxu0 %v3371_v22  ;;  %v2945_v39 = vld [vmem:[%s4672_s9 + $0xa8] sm:$0xff] }
 0x3ad   : > { %3084 = vmatpush3.msra.mxu0 %v2933_v28  ;;  %v2090_v45 = vld [vmem:[%s4672_s9 + $0x48] sm:$0xff] }
 0x3ae   : > { %v1884_v46 = vadd.f32 %v1878_v52, %v1767_v51  ;;  %v1899_v54 = vadd.f32 %v1890_v48, %v1883_v50  ;;  %3085 = vmatprep.subr.mxu0 %v3371_v22  ;;  %v2975_v47 = vld [vmem:[%s4672_s9 + $0x188] sm:$0xff]  ;;  %v2089_v50 = vld [vmem:[%s4672_s9 + $0x40] sm:$0xff]  ;;  %v2088_v52 = vld [vmem:[%s4672_s9 + $0x38] sm:$0xff] }
 0x3af   : > { %3086 = vmatpush3.msra.mxu0 %v2932_v40  ;;  %v2974_v51 = vld [vmem:[%s4672_s9 + $0x180] sm:$0xff]  ;;  %v2087_v48 = vld [vmem:[%s4672_s9 + $0x30] sm:$0xff]  ;;  %v2508_v28 = vld [vmem:[%s4674_s11 + $0x8] sm:$0xff] }
 0x3b0   : > { %v1900_v58 = vadd.f32 %v1894_v49, %v1884_v46  ;;  %3090 = vmatprep.subr.mxu0 %v3371_v22  ;;  %v2972_v46 = vld [vmem:[%s4672_s9 + $0x170] sm:$0xff] }
 0x3b2   : > { %3297 = vtanh.f32 %v1900_v58  ;;  %v2085_v58 = vld [vmem:[%s4672_s9 + $0x20] sm:$0xff] }
 0x3b3   : > { %3299 = vtanh.f32 %v1899_v54  ;;  %v2086_v54 = vld [vmem:[%s4672_s9 + $0x28] sm:$0xff] }
 0x3b4   : > { %3301 = vtanh.f32 %v1898_v56  ;;  %v2971_v56 = vld [vmem:[%s4672_s9 + $0x168] sm:$0xff] }
 0x3b5   : > { %3303 = vtanh.f32 %v1897_v59  ;;  %v2970_v59 = vld [vmem:[%s4672_s9 + $0x160] sm:$0xff] }
 0x3bf   : > { %v3298_v60 = vpop.eup %3297 }
 0x3c0   : > { %v3300_v61 = vpop.eup %3299  ;;  %2928 = vmatprep.subr.msk.mxu1 %vm1910_vm8, %v3298_v60  ;;  %v2084_v60 = vld [vmem:[%s4672_s9 + $0x18] sm:$0xff] }
 0x3c1   : > { %v3302_v25 = vpop.eup %3301  ;;  %2929 = vmatpush1.msk.msra.mxu1 %vm1910_vm8, %v3300_v61  ;;  %v2969_v61 = vld [vmem:[%s4672_s9 + $0x158] sm:$0xff] }
 0x3c2   : > { %v3304_v18 = vpop.eup %3303  ;;  %1947 = vmatprep.subr.mxu1 %v3302_v25  ;;  %v2083_v25 = vld [vmem:[%s4672_s9 + $0x10] sm:$0xff] }
 0x3c3   : > { %1948 = vmatpush1.msra.mxu1 %v3304_v18  ;;  %v2082_v18 = vld [vmem:[%s4672_s9 + $0x8] sm:$0xff] }
 0x3c4   : > { %2930 = vmatmul.mubr.msk.f32.vlgmr.msra.gmra.mxu1 %vm1906_vm9, %v1905_v3  ;;  %2011 = vmatprep.subr.mxu1 %v3371_v22  ;;  %v2968_v3 = vld [vmem:[%s4672_s9 + $0x150] sm:$0xff] }
 0x3c5   : > { %2012 = vmatpush1.msra.mxu1 %v2003_v62  ;;  %v2967_v62 = vld [vmem:[%s4672_s9 + $0x148] sm:$0xff] }
 0x3c6   : > { %2013 = vmatprep.subr.mxu1 %v3371_v22 }
 0x3c7   : > { %2014 = vmatpush1.msra.mxu1 %v2002_v63  ;;  %v2081_v63 = vld [vmem:[%s4672_s9] sm:$0xff] }
 0x3c8   : > { %2015 = vmatprep.subr.mxu1 %v3371_v22 }
 0x3c9   : > { %2016 = vmatpush1.msra.mxu1 %v2001_v0  ;;  %v2966_v0 = vld [vmem:[%s4672_s9 + $0x140] sm:$0xff] }
 0x3ca   : > { %2017 = vmatprep.subr.mxu1 %v3371_v22 }
 0x3cb   : > { %2018 = vmatpush1.msra.mxu1 %v2000_v1  ;;  %v2964_v1 = vld [vmem:[%s4672_s9 + $0x138] sm:$0xff] }
 0x3cc   : > { %2019 = vmatprep.subr.mxu1 %v3371_v22 }
 0x3cd   : > { %2020 = vmatpush1.msra.mxu1 %v1999_v2 }
 0x3ce   : > { %2021 = vmatprep.subr.mxu1 %v3371_v22 }
 0x3cf   : > { %2022 = vmatpush1.msra.mxu1 %v1998_v4  ;;  %v2963_v4 = vld [vmem:[%s4672_s9 + $0x130] sm:$0xff] }
 0x3d0   : > { %2023 = vmatprep.subr.mxu1 %v3371_v22 }
 0x3d1   : > { %2024 = vmatpush1.msra.mxu1 %v1997_v5  ;;  %v2962_v5 = vld [vmem:[%s4672_s9 + $0x128] sm:$0xff] }
 0x3d2   : > { %2025 = vmatprep.subr.mxu1 %v3371_v22 }
 0x3d3   : > { %2026 = vmatpush1.msra.mxu1 %v1996_v6  ;;  %v2961_v6 = vld [vmem:[%s4672_s9 + $0x120] sm:$0xff] }
 0x3d4   : > { %2027 = vmatprep.subr.mxu1 %v3371_v22 }
 0x3d5   : > { %2028 = vmatpush1.msra.mxu1 %v1995_v7  ;;  %v2960_v7 = vld [vmem:[%s4672_s9 + $0x118] sm:$0xff] }
 0x3d6   : > { %2029 = vmatprep.subr.mxu1 %v3371_v22 }
 0x3d7   : > { %2030 = vmatpush1.msra.mxu1 %v1994_v8  ;;  %v2959_v8 = vld [vmem:[%s4672_s9 + $0x110] sm:$0xff] }
 0x3d8   : > { %2031 = vmatprep.subr.mxu1 %v3371_v22 }
 0x3d9   : > { %2032 = vmatpush1.msra.mxu1 %v1993_v9  ;;  %v2958_v9 = vld [vmem:[%s4672_s9 + $0x108] sm:$0xff] }
 0x3da   : > { %2033 = vmatprep.subr.mxu1 %v3371_v22 }
 0x3db   : > { %2034 = vmatpush1.msra.mxu1 %v1992_v10  ;;  %v2957_v10 = vld [vmem:[%s4672_s9 + $0x100] sm:$0xff] }
 0x3dc   : > { %2035 = vmatprep.subr.mxu1 %v3371_v22 }
 0x3dd   : > { %2036 = vmatpush1.msra.mxu1 %v1991_v11  ;;  %v2956_v11 = vld [vmem:[%s4672_s9 + $0xf8] sm:$0xff] }
 0x3de   : > { %2037 = vmatprep.subr.mxu1 %v3371_v22 }
 0x3df   : > { %2038 = vmatpush1.msra.mxu1 %v1990_v12  ;;  %v2955_v12 = vld [vmem:[%s4672_s9 + $0xf0] sm:$0xff] }
 0x3e0   : > { %2039 = vmatprep.subr.mxu1 %v3371_v22 }
 0x3e1   : > { %2040 = vmatpush1.msra.mxu1 %v1989_v13 }
 0x3e2   : > { %2041 = vmatprep.subr.mxu1 %v3371_v22 }
 0x3e3   : > { %2042 = vmatpush1.msra.mxu1 %v1988_v57  ;;  %v2521_v57 = vld [vmem:[%s4674_s11 + $0x70] sm:$0xff] }
 0x3e4   : > { %2067 = vmatprep.subr.mxu1 %v3371_v22 }
 0x3e5   : > { %2068 = vmatpush2.msra.mxu1 %v2007_v14  ;;  %v2520_v14 = vld [vmem:[%s4674_s11 + $0x68] sm:$0xff] }
 0x3e6   : > { %2069 = vmatprep.subr.mxu1 %v3371_v22 }
 0x3e7   : > { %2070 = vmatpush2.msra.mxu1 %v2006_v15  ;;  %v2519_v15 = vld [vmem:[%s4674_s11 + $0x60] sm:$0xff] }
 0x3e8   : > { %2071 = vmatprep.subr.mxu1 %v3371_v22 }
 0x3e9   : > { %2072 = vmatpush2.msra.mxu1 %v2005_v16  ;;  %v2518_v16 = vld [vmem:[%s4674_s11 + $0x58] sm:$0xff] }
 0x3ea   : > { %2073 = vmatprep.subr.mxu1 %v3371_v22 }
 0x3eb   : > { %2074 = vmatpush2.msra.mxu1 %v2004_v17  ;;  %v2517_v17 = vld [vmem:[%s4674_s11 + $0x50] sm:$0xff] }
 0x3ec   : > { %3113 = vmatprep.subr.mxu1 %v3371_v22 }
 0x484   : > { %v1983_v31 = vpop.f32.mrf.mxu1 }
 0x486   : > { %v1985_v32 = vpop.f32.mrf.mxu1 }
 0x487   : > { %2931 = vmatprep.mubr.msk.f32.mxu1 %vm525_vm1, %v1985_v32  ;;  %v2608_v32 = vld [vmem:[%s4676_s13 + $0x50] sm:$0xf] }
 0x488   : > { %2076 = vmatmul.mubr.f32.vlgmr.msra.gmra.mxu1 %v1983_v31  ;;  %v2507_v31 = vld [vmem:[%s4674_s11] sm:$0xff] }
 0x489   : > { %3114 = vmatpush3.msra.mxu1 %v2953_v29  ;;  %3133 = vmatprep.mubr.msk.f32.mxu1 %vm3372_vm10, %v3371_v22  ;;  %v2607_v29 = vld [vmem:[%s4676_s13 + $0x48] sm:$0xff] }
 0x48a   : > { %3115 = vmatprep.subr.mxu1 %v3371_v22 }
 0x48b   : > { %3116 = vmatpush3.msra.mxu1 %v2952_v30 }
 0x48c   : > { %3117 = vmatprep.subr.mxu1 %v3371_v22 }
 0x48d   : > { %3118 = vmatpush3.msra.mxu1 %v2951_v33 }
 0x48e   : > { %3119 = vmatprep.subr.mxu1 %v3371_v22 }
 0x48f   : > { %3120 = vmatpush3.msra.mxu1 %v2950_v34 }
 0x490   : > { %3121 = vmatprep.subr.mxu1 %v3371_v22 }
 0x491   : > { %3122 = vmatpush3.msra.mxu1 %v2949_v35 }
 0x492   : > { %3123 = vmatprep.subr.mxu1 %v3371_v22 }
 0x493   : > { %3124 = vmatpush3.msra.mxu1 %v2948_v36 }
 0x494   : > { %3125 = vmatprep.subr.mxu1 %v3371_v22 }
 0x495   : > { %3126 = vmatpush3.msra.mxu1 %v2947_v37 }
 0x496   : > { %3127 = vmatprep.subr.mxu1 %v3371_v22 }
 0x497   : > { %3128 = vmatpush3.msra.mxu1 %v2946_v38 }
 0x498   : > { %3129 = vmatprep.subr.mxu1 %v3371_v22 }
 0x499   : > { %3130 = vmatpush3.msra.mxu1 %v2945_v39 }
 0x49a   : > { %3131 = vmatprep.subr.mxu1 %v3371_v22 }
 0x49b   : > { %3132 = vmatpush3.msra.mxu1 %v2944_v41 }
 0x49c   : > { %3159 = vmatprep.subr.mxu1 %v3371_v22 }
 0x548   : > { %v4368_v42 = vpop.f32.mrf.mxu1 }
 0x549   : > { %v2103_v43 = vrot.slane %v4368_v42, 1  ;;  %v2260_v44 = vrot.slane %v4368_v42, 2  ;;  %v2430_v2 = vrot.slane %v4368_v42, 4  ;;  %v2345_v13 = vrot.slane %v4368_v42, 3 }
 0x54a   : > { %v2079_v49 = vpop.f32.mrf.mxu1 }
 0x54b   : > { %3088 = vmatmul.mubr.msk.f32.vlgmr.msra.gmra.mxu0 %vm2104_vm11, %v2103_v43  ;;  %3134 = vmatmul.mubr.msk.f32.vlgmr.msra.gmra.mxu1 %vm2104_vm11, %v2260_v44  ;;  %v2504_v44 = vld [vmem:[%s4673_s10] sm:$0x1] }
 0x54c   : > { %3091 = vmatpush3.msra.mxu0 %v2090_v45  ;;  %3160 = vmatpush3.msra.mxu1 %v2975_v47 }
 0x54d   : > { %3092 = vmatprep.subr.mxu0 %v3371_v22  ;;  %3161 = vmatprep.subr.mxu1 %v3371_v22 }
 0x54e   : > { %3093 = vmatpush3.msra.mxu0 %v2089_v50  ;;  %3162 = vmatpush3.msra.mxu1 %v2974_v51  ;;  %v2606_v51 = vld [vmem:[%s4676_s13 + $0x40] sm:$0xff] }
 0x54f   : > { %3094 = vmatprep.subr.mxu0 %v3371_v22  ;;  %3163 = vmatprep.subr.mxu1 %v3371_v22 }
 0x550   : > { %3095 = vmatpush3.msra.mxu0 %v2088_v52  ;;  %3164 = vmatpush3.msra.mxu1 %v2973_v53  ;;  %v2605_v52 = vld [vmem:[%s4676_s13 + $0x38] sm:$0xff]  ;;  %v2604_v53 = vld [vmem:[%s4676_s13 + $0x30] sm:$0xff] }
 0x551   : > { %3096 = vmatprep.subr.mxu0 %v3371_v22  ;;  %3165 = vmatprep.subr.mxu1 %v3371_v22 }
 0x552   : > { %3097 = vmatpush3.msra.mxu0 %v2087_v48  ;;  %3166 = vmatpush3.msra.mxu1 %v2972_v46  ;;  %v2603_v48 = vld [vmem:[%s4676_s13 + $0x28] sm:$0xff]  ;;  %v2602_v46 = vld [vmem:[%s4676_s13 + $0x20] sm:$0xff] }
 0x553   : > { %3098 = vmatprep.subr.mxu0 %v3371_v22  ;;  %3167 = vmatprep.subr.mxu1 %v3371_v22 }
 0x554   : > { %3099 = vmatpush3.msra.mxu0 %v2086_v54  ;;  %3168 = vmatpush3.msra.mxu1 %v2971_v56  ;;  %v2601_v54 = vld [vmem:[%s4676_s13 + $0x18] sm:$0xff]  ;;  %v2600_v56 = vld [vmem:[%s4676_s13 + $0x10] sm:$0xff] }
 0x555   : > { %3100 = vmatprep.subr.mxu0 %v3371_v22  ;;  %3169 = vmatprep.subr.mxu1 %v3371_v22 }
 0x556   : > { %3101 = vmatpush3.msra.mxu0 %v2085_v58  ;;  %3170 = vmatpush3.msra.mxu1 %v2970_v59  ;;  %v2599_v58 = vld [vmem:[%s4676_s13 + $0x8] sm:$0xff]  ;;  %v2598_v59 = vld [vmem:[%s4676_s13] sm:$0xff] }
 0x557   : > { %3102 = vmatprep.subr.mxu0 %v3371_v22  ;;  %3171 = vmatprep.subr.mxu1 %v3371_v22 }
 0x558   : > { %3103 = vmatpush3.msra.mxu0 %v2084_v60  ;;  %3172 = vmatpush3.msra.mxu1 %v2969_v61  ;;  %v2522_v60 = vld [vmem:[%s4675_s12] sm:$0x1] }
 0x559   : > { %3104 = vmatprep.subr.mxu0 %v3371_v22  ;;  %3173 = vmatprep.subr.mxu1 %v3371_v22 }
 0x55a   : > { %3105 = vmatpush3.msra.mxu0 %v2083_v25  ;;  %3174 = vmatpush3.msra.mxu1 %v2968_v3 }
 0x55b   : > { %3106 = vmatprep.subr.mxu0 %v3371_v22  ;;  %3175 = vmatprep.subr.mxu1 %v3371_v22 }
 0x55c   : > { %3107 = vmatpush3.msra.mxu0 %v2082_v18  ;;  %3176 = vmatpush3.msra.mxu1 %v2967_v62  ;;  %v2609_v62 = vld [vmem:[%s4677_s14] sm:$0x1] }
 0x55d   : > { %3108 = vmatprep.subr.mxu0 %v3371_v22  ;;  %3177 = vmatprep.subr.mxu1 %v3371_v22 }
 0x55e   : > { %3109 = vmatpush3.msra.mxu0 %v2081_v63  ;;  %3110 = vmatprep.mubr.msk.f32.mxu0 %vm3372_vm10, %v3371_v22 }
 0x55f   : > { %3178 = vmatpush3.msra.mxu1 %v2966_v0  ;;  %3179 = vmatprep.mubr.msk.f32.mxu1 %vm3372_vm10, %v3371_v22 }
 0x560   : > { %3111 = vmatmul.mubr.msk.f32.vlgmr.msra.gmra.mxu0 %vm2104_vm11, %v4368_v42  ;;  %3136 = vmatprep.subr.mxu0 %v3371_v22 }
 0x561   : > { %3180 = vmatmul.mubr.msk.f32.vlgmr.msra.gmra.mxu1 %vm2104_vm11, %v2430_v2  ;;  %3137 = vmatpush3.msra.mxu0 %v2964_v1 }
 0x562   : > { %3138 = vmatprep.subr.mxu0 %v3371_v22  ;;  %3156 = vmatprep.mubr.msk.f32.mxu0 %vm3372_vm10, %v3371_v22 }
 0x563   : > { %3139 = vmatpush3.msra.mxu0 %v2963_v4  ;;  %3215 = vmatprep.subr.mxu1 %v3371_v22 }
 0x564   : > { %3140 = vmatprep.subr.mxu0 %v3371_v22  ;;  %3237 = vmatprep.mubr.msk.f32.mxu1 %vm3372_vm10, %v3371_v22 }
 0x565   : > { %3141 = vmatpush3.msra.mxu0 %v2962_v5  ;;  %3216 = vmatpush3.msk.msra.mxu1 %vm973_vm4, %v2608_v32 }
 0x566   : > { %3142 = vmatprep.subr.mxu0 %v3371_v22  ;;  %3217 = vmatprep.subr.mxu1 %v3371_v22 }
 0x567   : > { %3143 = vmatpush3.msra.mxu0 %v2961_v6  ;;  %3218 = vmatpush3.msra.mxu1 %v2607_v29 }
 0x568   : > { %3144 = vmatprep.subr.mxu0 %v3371_v22  ;;  %3219 = vmatprep.subr.mxu1 %v3371_v22 }
 0x569   : > { %3145 = vmatpush3.msra.mxu0 %v2960_v7  ;;  %3220 = vmatpush3.msra.mxu1 %v2606_v51 }
 0x56a   : > { %3146 = vmatprep.subr.mxu0 %v3371_v22  ;;  %3221 = vmatprep.subr.mxu1 %v3371_v22 }
 0x56b   : > { %3147 = vmatpush3.msra.mxu0 %v2959_v8  ;;  %3222 = vmatpush3.msra.mxu1 %v2605_v52 }
 0x56c   : > { %3148 = vmatprep.subr.mxu0 %v3371_v22  ;;  %3223 = vmatprep.subr.mxu1 %v3371_v22 }
 0x56d   : > { %3149 = vmatpush3.msra.mxu0 %v2958_v9  ;;  %3224 = vmatpush3.msra.mxu1 %v2604_v53 }
 0x56e   : > { %3150 = vmatprep.subr.mxu0 %v3371_v22  ;;  %3225 = vmatprep.subr.mxu1 %v3371_v22 }
 0x56f   : > { %3151 = vmatpush3.msra.mxu0 %v2957_v10  ;;  %3226 = vmatpush3.msra.mxu1 %v2603_v48 }
 0x570   : > { %3152 = vmatprep.subr.mxu0 %v3371_v22  ;;  %3227 = vmatprep.subr.mxu1 %v3371_v22 }
 0x571   : > { %3153 = vmatpush3.msra.mxu0 %v2956_v11  ;;  %3228 = vmatpush3.msra.mxu1 %v2602_v46 }
 0x572   : > { %3154 = vmatprep.subr.mxu0 %v3371_v22  ;;  %3229 = vmatprep.subr.mxu1 %v3371_v22 }
 0x573   : > { %3155 = vmatpush3.msra.mxu0 %v2955_v12  ;;  %3230 = vmatpush3.msra.mxu1 %v2601_v54 }
 0x574   : > { %3157 = vmatmul.mubr.msk.f32.vlgmr.msra.gmra.mxu0 %vm2104_vm11, %v2345_v13  ;;  %3182 = vmatprep.subr.mxu0 %v3371_v22 }
 0x575   : > { %3212 = vmatprep.mubr.msk.f32.mxu0 %vm3372_vm10, %v3371_v22  ;;  %3183 = vmatpush3.msra.mxu0 %v2521_v57 }
 0x576   : > { %3184 = vmatprep.subr.mxu0 %v3371_v22  ;;  %3231 = vmatprep.subr.mxu1 %v3371_v22 }
 0x577   : > { %3185 = vmatpush3.msra.mxu0 %v2520_v14  ;;  %3232 = vmatpush3.msra.mxu1 %v2600_v56 }
 0x578   : > { %3186 = vmatprep.subr.mxu0 %v3371_v22  ;;  %3233 = vmatprep.subr.mxu1 %v3371_v22 }
 0x579   : > { %3187 = vmatpush3.msra.mxu0 %v2519_v15  ;;  %3234 = vmatpush3.msra.mxu1 %v2599_v58 }
 0x57a   : > { %3188 = vmatprep.subr.mxu0 %v3371_v22  ;;  %3235 = vmatprep.subr.mxu1 %v3371_v22 }
 0x57b   : > { %3189 = vmatpush3.msra.mxu0 %v2518_v16  ;;  %3236 = vmatpush3.msra.mxu1 %v2598_v59 }
 0x57c   : > { %3190 = vmatprep.subr.mxu0 %v3371_v22 }
 0x57d   : > { %3191 = vmatpush3.msra.mxu0 %v2517_v17 }
 0x57e   : > { %3192 = vmatprep.subr.mxu0 %v3371_v22 }
 0x57f   : > { %3193 = vmatpush3.msra.mxu0 %v2516_v19 }
 0x580   : > { %3194 = vmatprep.subr.mxu0 %v3371_v22 }
 0x581   : > { %3195 = vmatpush3.msra.mxu0 %v2515_v55 }
 0x582   : > { %3196 = vmatprep.subr.mxu0 %v3371_v22 }
 0x583   : > { %3197 = vmatpush3.msra.mxu0 %v2514_v20 }
 0x584   : > { %3198 = vmatprep.subr.mxu0 %v3371_v22 }
 0x585   : > { %3199 = vmatpush3.msra.mxu0 %v2513_v21 }
 0x586   : > { %3200 = vmatprep.subr.mxu0 %v3371_v22 }
 0x587   : > { %3201 = vmatpush3.msra.mxu0 %v2512_v23 }
 0x588   : > { %3202 = vmatprep.subr.mxu0 %v3371_v22 }
 0x589   : > { %3203 = vmatpush3.msra.mxu0 %v2511_v24 }
 0x58a   : > { %3204 = vmatprep.subr.mxu0 %v3371_v22 }
 0x58b   : > { %3205 = vmatpush3.msra.mxu0 %v2510_v26 }
 0x58c   : > { %3206 = vmatprep.subr.mxu0 %v3371_v22 }
 0x58d   : > { %3207 = vmatpush3.msra.mxu0 %v2509_v27 }
 0x58e   : > { %3208 = vmatprep.subr.mxu0 %v3371_v22 }
 0x58f   : > { %3209 = vmatpush3.msra.mxu0 %v2508_v28 }
 0x590   : > { %3210 = vmatprep.subr.mxu0 %v3371_v22 }
 0x591   : > { %3211 = vmatpush3.msra.mxu0 %v2507_v31 }
 0x60b   : > { %v2173_v30 = vpop.f32.mrf.mxu0  ;;  %v2329_v33 = vpop.f32.mrf.mxu1 }
 0x60d   : > { %v3089_v34 = vpop.f32.mrf.mxu0  ;;  %v3135_v35 = vpop.f32.mrf.mxu1 }
 0x620   : > { %v2245_v36 = vpop.f32.mrf.mxu0 }
 0x621   : > { %v2499_v37 = vpop.f32.mrf.mxu1  ;;  %v2246_v40 = vadd.f32 %v2245_v36, %v2173_v30 }
 0x622   : > { %v3112_v38 = vpop.f32.mrf.mxu0 }
 0x623   : > { %v3181_v39 = vpop.f32.mrf.mxu1  ;;  %v2333_v41 = vadd.f32 %v2329_v33, %v2246_v40 }
 0x634   : > { %v2414_v42 = vpop.f32.mrf.mxu0 }
 0x635   : > { %v2418_v43 = vadd.f32 %v2414_v42, %v2333_v41 }
 0x636   : > { %v3158_v45 = vpop.f32.mrf.mxu0 }
 0x637   : > { %v2503_v47 = vadd.f32 %v2499_v37, %v2418_v43 }
 0x639   : > { %v2505_v49 = vadd.f32 %v2504_v44, %v2503_v47 }
 0x63b   : > { %3305 = vtanh.f32 %v2505_v49 }
 0x648   : > { %v3306_v50 = vpop.eup %3305 }
 0x649   : > { %3213 = vmatmul.mubr.msk.f32.vlgmr.msra.gmra.mxu0 %vm2523_vm12, %v3306_v50 }
 0x709   : > { %v2593_v61 = vpop.f32.mrf.mxu0 }
 0x70a   : > { %v2594_v25 = vadd.f32 %v2593_v61, %v2522_v60 }
 0x70b   : > { %v3214_v3 = vpop.f32.mrf.mxu0 }
 0x70c   : > { %3307 = vtanh.f32 %v2594_v25 }
 0x719   : > { %v3308_v18 = vpop.eup %3307 }
 0x71a   : > { %3238 = vmatmul.mubr.msk.f32.vlgmr.msra.gmra.mxu1 %vm1359_vm7, %v3308_v18 }
 0x7da   : > { %v2682_v22 = vpop.f32.mrf.mxu1 }
 0x7db   : > { %v2683_v63 = vadd.f32 %v2682_v22, %v2609_v62 }
 0x7dc   : > { %v3239_v0 = vpop.f32.mrf.mxu1 }
 0x7dd   : > { %2687 = vst.msk [vmem:[%s486_s27] sm:$0x1] %vm2686_vm13, %v2683_v63 }
 0x7de   : > { %3322 = shalt.err (!%p3319_p3)
}
 0x7df   : > { %s3323_s26 = scalar_lea.hbm %s4628_s16, 16  ;;  %s3327_s27 = scalar_lea.hbm %s4678_s15, 32 }
 0x7e0   : > { %p3324_p4 = scmp.ne.s32.totalorder %s4628_s16, %s3323_s26  ;;  %p3328_p9 = scmp.lt.s32.totalorder %s4628_s16, %s4678_s15 }
 0x7e1   : > { %p3329_p10 = scmp.lt.s32.totalorder %s3327_s27, %s3323_s26 }
 0x7e2   : > { %p3325_p7 = pnand %p3324_p4, %p3492_p5 }
 0x7e3   : > { %p3330_p11 = por %p3329_p10, %p3328_p9 }
 0x7e4   : > { %p3326_p8 = pneg %p3325_p7 }
 0x7e6   : > { %p3331_p12 = pnand %p3330_p11, %p3326_p8 }
 0x7e8   : > { %3334 = shalt.err (!%p3331_p12)
}
 0x7e9   : > { %3240 = dma.vmem_to_hbm [thread:$0]  (%p3492_p5), %s2702_s30, 16, %s4628_s16, %s2689_s17  }
 0x7ea PF: > { %s4693_s23 = sld [smem:[#allocation7_spill]] }
 0x7eb   : > { %s4694_s22 = sld [smem:[#allocation5_spill]] }
 0x7f0   : > { %p3246_p13 = scmp.ge.s32.totalorder %s4693_s23, 2 }
 0x7f1   : > { %s2713_s24 = sand.u32 1, %s4694_s22  }
 0x7f2   : > { %p3243_p0 = pnand %p3246_p13, %p3496_p6  ;;  %s2714_s21 = scalar_lea.sflag [#allocation3], %s2713_s24 }
 0x7f4   : > { %p3244_p1 = pneg %p3243_p0 }
 0x7f6   : > { %3352 = dma.done.wait (%p3244_p1), %s2714_s21, 16  }
 0x7f7   : > { %3354 = vsyncadd (%p3244_p1), %s2714_s21, 4294967280  ;;  %s4696_s21 = sld [smem:[#allocation8_spill]]  ;;  %s4699_s18 = smov %s3361_s19 }
 0x7f8   : > { %s4697_s26 = sld [smem:[#allocation6_spill]] }
 0x7f9   : > { %s4698_s20 = sld [smem:[#allocation9_spill]] }
 0x7fd   : > { %p25_p2 = scmp.ge.s32.totalorder %s4696_s21, 4  }
 0x7fe   : > { %s4700_s19 = smov %s4697_s26 }
 0x7ff   :  { %27 = sbr.rel (!%p25_p2) target bundleno = 3 (0x3), region = 127 }
 0x804   :  { %2718 = vsyncpa [#allocation3], 1 }
 0x805   :  { %2720 = vsyncpa [#allocation3 + $0x1], 1 }

</bundles_post_ra>
